<compile_context>
chip_gen: v7x
topology: tpu7x:2x2x1
jax: 0.10.0
libtpu: 0.0.40
codegen_flags: <defaults>
</compile_context>

<pallas_src>
import functools

import jax
import jax.numpy as jnp
from jax.experimental import pallas as pl
from jax.experimental.pallas import tpu as pltpu

EPS = 1e-5


# ----------------------------- in-kernel helpers -----------------------------


def _channel_stats(y):
    """Per-channel partial [sum, sum_sq] over the lane (spatial) axis -> (C, 2)."""
    return jnp.concatenate(
        [jnp.sum(y, axis=1, keepdims=True),
         jnp.sum(y * y, axis=1, keepdims=True)], axis=1)


def _fold_bn(stats_ref, gb_ref, inv_count):
    """Raw per-(image, tile) stats -> folded BN scale/shift of shape (C, 1).

    Done in-kernel so the tiny scale/shift never round-trips HBM and no extra
    XLA launch sits between pallas_calls; rsqrt lowers to the EUP slot.
    # TODO(synk): single-pass E[x^2]-E[x]^2 can cancel if |mean| >> std;
    # switch to shifted/two-pass stats if that regime matters.
    """
    total = jnp.sum(stats_ref[...], axis=(0, 1))          # (C, 2) f32
    mean = total[:, 0:1] * inv_count
    var = total[:, 1:2] * inv_count - mean * mean
    scale = gb_ref[:, 0:1] * jax.lax.rsqrt(var + EPS)
    shift = gb_ref[:, 1:2] - mean * scale
    return scale, shift


# ----------------------------- kernels ---------------------------------------


def conv1x1_stats_kernel(x_ref, w_ref, y_ref, stats_ref):
    # x_ref:     (1, Cin, hw)    bf16   one spatial tile of one image
    # w_ref:     (Cmid, Cin)     bf16   resident weight
    # y_ref:     (1, Cmid, hw)   bf16   pre-BN conv1 output
    # stats_ref: (1, 1, Cmid, 2) f32    partial [sum, sum_sq] per channel
    y = jnp.dot(w_ref[...], x_ref[0], preferred_element_type=jnp.float32)
    y_ref[0] = y.astype(y_ref.dtype)
    stats_ref[0, 0] = _channel_stats(y)


def bn_relu_conv3x3_stats_kernel(y1_ref, stats1_ref, gb1_ref, w2_ref, mask_ref,
                                 y2_ref, stats2_ref, *, H, W, inv_count):
    # y1_ref:     (1, Cmid, HW)     bf16  pre-BN conv1 output (full image)
    # stats1_ref: (N, T1, Cmid, 2)  f32   resident raw partial BN1 stats
    # gb1_ref:    (Cmid, 2)         f32   resident [gamma, beta]
    # w2_ref:     (9, Cmid, Cmid)   bf16  resident per-tap weights, k = kh*3+kw
    # mask_ref:   (9, 1, HW)        f32   resident per-tap boundary masks
    # y2_ref:     (1, Cmid, HW)     bf16  pre-BN conv2 output
    # stats2_ref: (1, 1, Cmid, 2)   f32   partial BN2 stats
    HW = H * W
    scale, shift = _fold_bn(stats1_ref, gb1_ref, inv_count)
    # BN1 (folded) + ReLU in f32 (keeps the roll/mask path fast on v5e too).
    a = jnp.maximum(y1_ref[0].astype(jnp.float32) * scale + shift, 0.0)

    # 3x3 conv as 9 shifted per-tap matmuls accumulated in f32: no im2col
    # scratch is materialised or re-read.
    acc = None
    for kh in range(3):
        for kw in range(3):
            k = kh * 3 + kw
            off = (kh - 1) * W + (kw - 1)
            shifted = a if off == 0 else pltpu.roll(a, shift=(-off) % HW, axis=1)
            tap = (shifted * mask_ref[k]).astype(jnp.bfloat16)
            contrib = jnp.dot(w2_ref[k], tap,
                              preferred_element_type=jnp.float32)
            acc = contrib if acc is None else acc + contrib
    y2_ref[0] = acc.astype(y2_ref.dtype)
    stats2_ref[0, 0] = _channel_stats(acc)


def bn_relu_conv1x1_stats_kernel(y2_ref, stats2_ref, gb2_ref, w3_ref,
                                 y3_ref, stats3_ref, *, inv_count):
    # BN2 (folded, from raw stats) + ReLU + conv3 (1x1) + partial BN3 stats.
    scale, shift = _fold_bn(stats2_ref, gb2_ref, inv_count)
    a = jnp.maximum(y2_ref[0].astype(jnp.float32) * scale + shift, 0.0)
    y3 = jnp.dot(w3_ref[...], a.astype(jnp.bfloat16),
                 preferred_element_type=jnp.float32)
    y3_ref[0] = y3.astype(y3_ref.dtype)
    stats3_ref[0, 0] = _channel_stats(y3)


def bn_add_relu_kernel(y3_ref, stats3_ref, gb3_ref, x_ref, out_ref, *, inv_count):
    # BN3 (folded) + residual add (f32 residual) + ReLU.  downsample=None.
    scale, shift = _fold_bn(stats3_ref, gb3_ref, inv_count)
    out_ref[0] = jnp.maximum(
        y3_ref[0].astype(jnp.float32) * scale + shift + x_ref[0], 0.0)


# ----------------------------- wrapper helpers --------------------------------


def _pick_hw_tile(HW, N, target_steps=8, max_tile=2048):
    """Largest lane-aligned (multiple of 128) tile of the flattened spatial dim
    that still gives each pointwise pallas_call >= ~target_steps grid steps,
    so BlockSpec double-buffering has work to overlap and both v7x TCs stay fed."""
    if HW % 128 != 0:
        return HW
    cands = [d for d in range(128, min(HW, max_tile) + 1, 128) if HW % d == 0]
    if not cands:
        return HW
    tiles_needed = max(1, -(-target_steps // N))
    ok = [d for d in cands if HW // d >= tiles_needed]
    return max(ok) if ok else min(cands)


def _sizeof(shape, itemsize):
    n = 1
    for d in shape:
        n *= int(d)
    return n * itemsize


def _vmem_limit_bytes(per_step_bytes):
    """2x for double-buffering + headroom, capped well under physical per-core
    VMEM (64 MiB on v7x, 128 MiB on v5e/v6e) instead of hard-coding 64 MiB."""
    phys = 64 << 20                      # assume smallest (v7x) if query fails
    try:
        info = pltpu.get_tpu_info()
        phys = int(getattr(info, "vmem_capacity_bytes", phys)) or phys
    except Exception:
        pass
    need = 2 * per_step_bytes + (4 << 20)
    cap = max(16 << 20, (phys * 5) // 8)  # ~40 MiB on v7x, ~80 MiB on v5e/v6e
    return int(min(max(need, 16 << 20), cap))


# ----------------------------- forward ----------------------------------------


def bottleneck_forward(x_nchw, params):
    w1, g1, b1, w2, g2, b2, w3, g3, b3 = params
    N, Cin, H, W = x_nchw.shape
    Cmid = w1.shape[0]
    Cout = w3.shape[0]
    # TODO(synk): stride>1 / downsample module / noBN=True second return not implemented.
    assert Cout == Cin, "no-downsample config requires inplanes == planes*4"
    HW = H * W
    inv_count = 1.0 / float(N * HW)

    hw_tile = _pick_hw_tile(HW, N)
    T = HW // hw_tile

    # Free reshape: NCHW order kept, spatial flattened onto the lane dim.
    xf = x_nchw.reshape(N, Cin, HW).astype(jnp.float32)    # f32 residual (stage 4)
    xbf = xf.astype(jnp.bfloat16)                          # bf16 conv1 input

    # One-time tiny weight / BN-param reshapes; MXU operands in bf16.
    w1k = w1[:, :, 0, 0].astype(jnp.bfloat16)                        # (Cmid, Cin)
    w2k = jnp.transpose(w2, (2, 3, 0, 1)).reshape(9, Cmid, Cmid)     # taps (k, cout, cin)
    w2k = w2k.astype(jnp.bfloat16)
    w3k = w3[:, :, 0, 0].astype(jnp.bfloat16)                        # (Cout, Cmid)
    gb1 = jnp.stack([g1, b1], axis=1).astype(jnp.float32)            # (Cmid, 2)
    gb2 = jnp.stack([g2, b2], axis=1).astype(jnp.float32)
    gb3 = jnp.stack([g3, b3], axis=1).astype(jnp.float32)

    # Precompute the 9 boundary masks once (resident input), not per grid step.
    lane = jnp.arange(HW, dtype=jnp.int32)
    h_idx, w_idx = lane // W, lane % W
    masks = []
    for kh in range(3):
        for kw in range(3):
            dh, dw = kh - 1, kw - 1
            masks.append((h_idx + dh >= 0) & (h_idx + dh < H) &
                         (w_idx + dw >= 0) & (w_idx + dw < W))
    mask9 = jnp.stack(masks).astype(jnp.float32).reshape(9, 1, HW)

    # Computed VMEM limit (stage 2 / stage 4 are the largest per-step footprints).
    s2_bytes = (_sizeof((1, Cmid, HW), 2) * 2 +            # y1 in + y2 out (bf16)
                _sizeof((N, T, Cmid, 2), 4) +              # stats1 (resident)
                _sizeof((Cmid, 2), 4) +                    # gamma/beta
                _sizeof((9, Cmid, Cmid), 2) +              # per-tap weights
                _sizeof((9, 1, HW), 4) +                   # masks
                _sizeof((1, 1, Cmid, 2), 4) +              # stats2 out
                4 * Cmid * HW * 4)                         # f32 a/roll/acc temps
    s4_bytes = (_sizeof((1, Cout, hw_tile), 2) +           # y3 in (bf16)
                _sizeof((N, T, Cout, 2), 4) +              # stats3
                _sizeof((Cout, 2), 4) +
                2 * _sizeof((1, Cout, hw_tile), 4))        # f32 residual + out
    vmem_limit = _vmem_limit_bytes(max(s2_bytes, s4_bytes))

    cp2d = pltpu.CompilerParams(dimension_semantics=("parallel", "parallel"),
                                vmem_limit_bytes=vmem_limit)
    cp1d = pltpu.CompilerParams(dimension_semantics=("parallel",),
                                vmem_limit_bytes=vmem_limit)

    def tile_spec(C):        # (image, spatial-tile) activation block
        return pl.BlockSpec((1, C, hw_tile), lambda n, t: (n, 0, t))

    def img_spec(C):         # full image (stage 2 needs whole rows for rolls)
        return pl.BlockSpec((1, C, HW), lambda n: (n, 0, 0))

    def res2(shape):         # resident block on the 2-D (n, t) grid
        return pl.BlockSpec(shape, lambda n, t: (0,) * len(shape))

    def res1(shape):         # resident block on the 1-D (n,) grid
        return pl.BlockSpec(shape, lambda n: (0,) * len(shape))

    def stats_spec2(C):
        return pl.BlockSpec((1, 1, C, 2), lambda n, t: (n, t, 0, 0))

    # ---- stage 1: conv1 (1x1) + partial BN1 stats ---------------------------
    y1, s1 = pl.pallas_call(
        conv1x1_stats_kernel,
        grid=(N, T),
        in_specs=[tile_spec(Cin), res2((Cmid, Cin))],
        out_specs=(tile_spec(Cmid), stats_spec2(Cmid)),
        out_shape=(jax.ShapeDtypeStruct((N, Cmid, HW), jnp.bfloat16),
                   jax.ShapeDtypeStruct((N, T, Cmid, 2), jnp.float32)),
        compiler_params=cp2d,
    )(xbf, w1k)

    # ---- stage 2: bn1+relu -> conv2 (3x3, 9 shifted matmuls) + BN2 stats ----
    # TODO(synk): for very large H*W, tile H with a halo instead of one full image per step.
    y2, s2 = pl.pallas_call(
        functools.partial(bn_relu_conv3x3_stats_kernel, H=H, W=W,
                          inv_count=inv_count),
        grid=(N,),
        in_specs=[img_spec(Cmid), res1((N, T, Cmid, 2)), res1((Cmid, 2)),
                  res1((9, Cmid, Cmid)), res1((9, 1, HW))],
        out_specs=(img_spec(Cmid),
                   pl.BlockSpec((1, 1, Cmid, 2), lambda n: (n, 0, 0, 0))),
        out_shape=(jax.ShapeDtypeStruct((N, Cmid, HW), jnp.bfloat16),
                   jax.ShapeDtypeStruct((N, 1, Cmid, 2), jnp.float32)),
        compiler_params=cp1d,
    )(y1, s1, gb1, w2k, mask9)

    # ---- stage 3: bn2+relu -> conv3 (1x1) + partial BN3 stats ----------------
    y3, s3 = pl.pallas_call(
        functools.partial(bn_relu_conv1x1_stats_kernel, inv_count=inv_count),
        grid=(N, T),
        in_specs=[tile_spec(Cmid), res2((N, 1, Cmid, 2)), res2((Cmid, 2)),
                  res2((Cout, Cmid))],
        out_specs=(tile_spec(Cout), stats_spec2(Cout)),
        out_shape=(jax.ShapeDtypeStruct((N, Cout, HW), jnp.bfloat16),
                   jax.ShapeDtypeStruct((N, T, Cout, 2), jnp.float32)),
        compiler_params=cp2d,
    )(y2, s2, gb2, w3k)

    # ---- stage 4: bn3 + residual add (f32) + relu ----------------------------
    out = pl.pallas_call(
        functools.partial(bn_add_relu_kernel, inv_count=inv_count),
        grid=(N, T),
        in_specs=[tile_spec(Cout), res2((N, T, Cout, 2)), res2((Cout, 2)),
                  tile_spec(Cout)],
        out_specs=tile_spec(Cout),
        out_shape=jax.ShapeDtypeStruct((N, Cout, HW), jnp.float32),
        compiler_params=cp2d,
    )(y3, s3, gb3, xf)

    return out.reshape(N, Cout, H, W)                 # already NCHW


# ----------------------------- reference --------------------------------------


def bottleneck_ref(x, params):
    """Pure-JAX reference (NCHW, f32), mirrors the PyTorch forward (training BN)."""
    w1, g1, b1, w2, g2, b2, w3, g3, b3 = params

    def conv(x, w, pad):
        return jax.lax.conv_general_dilated(
            x, w, window_strides=(1, 1), padding=pad,
            dimension_numbers=('NCHW', 'OIHW', 'NCHW'))

    def bn(y, g, b):
        m = jnp.mean(y, axis=(0, 2, 3), keepdims=True)
        v = jnp.mean((y - m) ** 2, axis=(0, 2, 3), keepdims=True)
        return ((y - m) / jnp.sqrt(v + EPS)) * g.reshape(1, -1, 1, 1) \
            + b.reshape(1, -1, 1, 1)

    out = jax.nn.relu(bn(conv(x, w1, 'VALID'), g1, b1))
    out = jax.nn.relu(bn(conv(out, w2, [(1, 1), (1, 1)]), g2, b2))
    out = bn(conv(out, w3, 'VALID'), g3, b3)
    return jax.nn.relu(out + x)


# ----------------------------- main --------------------------------------------


if __name__ == "__main__":
    N, H, W = 2, 16, 16
    planes = 8
    inplanes = planes * 4   # 32 -> residual add works without a downsample

    key = jax.random.PRNGKey(0)
    ks = jax.random.split(key, 10)
    x = jax.random.normal(ks[0], (N, inplanes, H, W), jnp.float32)
    w1 = 0.1 * jax.random.normal(ks[1], (planes, inplanes, 1, 1), jnp.float32)
    w2 = 0.1 * jax.random.normal(ks[2], (planes, planes, 3, 3), jnp.float32)
    w3 = 0.1 * jax.random.normal(ks[3], (planes * 4, planes, 1, 1), jnp.float32)
    g1 = 1.0 + 0.1 * jax.random.normal(ks[4], (planes,), jnp.float32)
    b1 = 0.1 * jax.random.normal(ks[5], (planes,), jnp.float32)
    g2 = 1.0 + 0.1 * jax.random.normal(ks[6], (planes,), jnp.float32)
    b2 = 0.1 * jax.random.normal(ks[7], (planes,), jnp.float32)
    g3 = 1.0 + 0.1 * jax.random.normal(ks[8], (planes * 4,), jnp.float32)
    b3 = 0.1 * jax.random.normal(ks[9], (planes * 4,), jnp.float32)
    params = (w1, g1, b1, w2, g2, b2, w3, g3, b3)

    out = jax.jit(bottleneck_forward)(x, params)
    out = jax.block_until_ready(out)

    ref = bottleneck_ref(x, params)
    assert out.shape == ref.shape == (N, inplanes, H, W)
    err = float(jnp.max(jnp.abs(out - ref)))
    # bf16 MXU operands + bf16 inter-stage activations (f32 stats/accumulation)
    # leave a few e-2 max abs deviation vs the all-f32 reference.
    assert err < 8e-2, f"max abs err {err}"
    print("KERNEL_OK")
</pallas_src>

<mosaic_0001>
module attributes {stable_mosaic.version = 11 : i64} {
  func.func @conv1x1_stats_kernel(%arg0: i32, %arg1: i32, %arg2: memref<1x32x128xbf16, #tpu.memory_space<vmem>>, %arg3: memref<8x32xbf16, #tpu.memory_space<vmem>>, %arg4: memref<1x8x128xbf16, #tpu.memory_space<vmem>>, %arg5: memref<1x1x8x2xf32, #tpu.memory_space<vmem>>) attributes {dimension_semantics = [#tpu.dimension_semantics<parallel>, #tpu.dimension_semantics<parallel>], iteration_bounds = array<i64: 2, 2>, scalar_prefetch = 0 : i64, scratch_operands = 0 : i64, tpu.core_type = #tpu.core_type<tc>, window_params = [{transform_indices = @transform_0, window_bounds = array<i64: 1, 32, 128>}, {pipeline_mode = #tpu.pipeline_mode<synchronous>, transform_indices = @transform_1, window_bounds = array<i64: 8, 32>}, {transform_indices = @transform_2, window_bounds = array<i64: 1, 8, 128>}, {transform_indices = @transform_3, window_bounds = array<i64: 1, 1, 8, 2>}]} {
    %c0 = arith.constant 0 : index
    %c0_0 = arith.constant 0 : index
    %0 = vector.load %arg3[%c0, %c0_0] : memref<8x32xbf16, #tpu.memory_space<vmem>>, vector<8x32xbf16>
    %c0_1 = arith.constant 0 : index
    %c0_2 = arith.constant 0 : index
    %c0_3 = arith.constant 0 : index
    %1 = vector.load %arg2[%c0_1, %c0_2, %c0_3] : memref<1x32x128xbf16, #tpu.memory_space<vmem>>, vector<1x32x128xbf16>
    %2 = vector.shape_cast %1 : vector<1x32x128xbf16> to vector<32x128xbf16>
    %cst = arith.constant dense<0.000000e+00> : vector<8x128xf32>
    %3 = tpu.matmul %0, %2, %cst {dimension_numbers = #tpu.dot_dimension_numbers<[1], [0], [0], [1], [0, 0, 1, 1], [], []>} : vector<8x32xbf16>, vector<32x128xbf16>, vector<8x128xf32> -> vector<8x128xf32>
    %4 = arith.truncf %3 : vector<8x128xf32> to vector<8x128xbf16>
    %c0_4 = arith.constant 0 : index
    %c0_5 = arith.constant 0 : index
    %c0_6 = arith.constant 0 : index
    %5 = vector.load %arg4[%c0_4, %c0_5, %c0_6] : memref<1x8x128xbf16, #tpu.memory_space<vmem>>, vector<1x8x128xbf16>
    %6 = vector.shape_cast %5 : vector<1x8x128xbf16> to vector<8x128xbf16>
    %7 = vector.shape_cast %4 : vector<8x128xbf16> to vector<1x8x128xbf16>
    tpu.vector_store %arg4[%c0_4, %c0_5, %c0_6], %7 {strides = array<i32>} : memref<1x8x128xbf16, #tpu.memory_space<vmem>>, vector<1x8x128xbf16>,
    %cst_7 = arith.constant dense<0.000000e+00> : vector<8xf32>
    %8 = vector.multi_reduction <add>, %3, %cst_7 [1] : vector<8x128xf32> to vector<8xf32>
    %9 = vector.shape_cast %8 : vector<8xf32> to vector<8x1xf32>
    %10 = arith.mulf %3, %3 : vector<8x128xf32>
    %cst_8 = arith.constant dense<0.000000e+00> : vector<8xf32>
    %11 = vector.multi_reduction <add>, %10, %cst_8 [1] : vector<8x128xf32> to vector<8xf32>
    %12 = vector.shape_cast %11 : vector<8xf32> to vector<8x1xf32>
    %13 = tpu.concatenate %9, %12 in 1 : vector<8x1xf32>, vector<8x1xf32> -> vector<8x2xf32>
    %c0_9 = arith.constant 0 : index
    %c0_10 = arith.constant 0 : index
    %c0_11 = arith.constant 0 : index
    %c0_12 = arith.constant 0 : index
    %14 = vector.load %arg5[%c0_9, %c0_10, %c0_11, %c0_12] : memref<1x1x8x2xf32, #tpu.memory_space<vmem>>, vector<1x1x8x2xf32>
    %15 = vector.shape_cast %14 : vector<1x1x8x2xf32> to vector<8x2xf32>
    %16 = vector.shape_cast %13 : vector<8x2xf32> to vector<1x1x8x2xf32>
    tpu.vector_store %arg5[%c0_9, %c0_10, %c0_11, %c0_12], %16 {strides = array<i32>} : memref<1x1x8x2xf32, #tpu.memory_space<vmem>>, vector<1x1x8x2xf32>,
    return
  }
  func.func @transform_0(%arg0: i32, %arg1: i32) -> (i32, i32, i32) {
    %c0_i32 = arith.constant 0 : i32
    %c0_i32_0 = arith.constant 0 : i32
    return %arg0, %c0_i32, %arg1 : i32, i32, i32
  }
  func.func @transform_1(%arg0: i32, %arg1: i32) -> (i32, i32) {
    %c0_i32 = arith.constant 0 : i32
    %c0_i32_0 = arith.constant 0 : i32
    %c0_i32_1 = arith.constant 0 : i32
    return %c0_i32, %c0_i32_0 : i32, i32
  }
  func.func @transform_2(%arg0: i32, %arg1: i32) -> (i32, i32, i32) {
    %c0_i32 = arith.constant 0 : i32
    %c0_i32_0 = arith.constant 0 : i32
    return %arg0, %c0_i32, %arg1 : i32, i32, i32
  }
  func.func @transform_3(%arg0: i32, %arg1: i32) -> (i32, i32, i32, i32) {
    %c0_i32 = arith.constant 0 : i32
    %c0_i32_0 = arith.constant 0 : i32
    %c0_i32_1 = arith.constant 0 : i32
    return %arg0, %arg1, %c0_i32, %c0_i32_0 : i32, i32, i32, i32
  }
}

module attributes {stable_mosaic.version = 11 : i64} {
  func.func @bn_relu_conv1x1_stats_kernel(%arg0: i32, %arg1: i32, %arg2: memref<1x8x128xbf16, #tpu.memory_space<vmem>>, %arg3: memref<2x1x8x2xf32, #tpu.memory_space<vmem>>, %arg4: memref<8x2xf32, #tpu.memory_space<vmem>>, %arg5: memref<32x8xbf16, #tpu.memory_space<vmem>>, %arg6: memref<1x32x128xbf16, #tpu.memory_space<vmem>>, %arg7: memref<1x1x32x2xf32, #tpu.memory_space<vmem>>) attributes {dimension_semantics = [#tpu.dimension_semantics<parallel>, #tpu.dimension_semantics<parallel>], iteration_bounds = array<i64: 2, 2>, scalar_prefetch = 0 : i64, scratch_operands = 0 : i64, tpu.core_type = #tpu.core_type<tc>, window_params = [{transform_indices = @transform_0, window_bounds = array<i64: 1, 8, 128>}, {pipeline_mode = #tpu.pipeline_mode<synchronous>, transform_indices = @transform_1, window_bounds = array<i64: 2, 1, 8, 2>}, {pipeline_mode = #tpu.pipeline_mode<synchronous>, transform_indices = @transform_2, window_bounds = array<i64: 8, 2>}, {pipeline_mode = #tpu.pipeline_mode<synchronous>, transform_indices = @transform_3, window_bounds = array<i64: 32, 8>}, {transform_indices = @transform_4, window_bounds = array<i64: 1, 32, 128>}, {transform_indices = @transform_5, window_bounds = array<i64: 1, 1, 32, 2>}]} {
    %c0 = arith.constant 0 : index
    %c0_0 = arith.constant 0 : index
    %c0_1 = arith.constant 0 : index
    %c0_2 = arith.constant 0 : index
    %0 = vector.load %arg3[%c0, %c0_0, %c0_1, %c0_2] : memref<2x1x8x2xf32, #tpu.memory_space<vmem>>, vector<2x1x8x2xf32>
    %cst = arith.constant dense<0.000000e+00> : vector<8x2xf32>
    %1 = vector.multi_reduction <add>, %0, %cst [0, 1] : vector<2x1x8x2xf32> to vector<8x2xf32>
    %2 = vector.extract_strided_slice %1 {offsets = [0, 0], sizes = [8, 1], strides = [1, 1]} : vector<8x2xf32> to vector<8x1xf32>
    %cst_3 = arith.constant 0.001953125 : f32
    %3 = vector.broadcast %cst_3 : f32 to vector<8x1xf32>
    %4 = arith.mulf %2, %3 : vector<8x1xf32>
    %5 = vector.extract_strided_slice %1 {offsets = [0, 1], sizes = [8, 1], strides = [1, 1]} : vector<8x2xf32> to vector<8x1xf32>
    %cst_4 = arith.constant 0.001953125 : f32
    %6 = vector.broadcast %cst_4 : f32 to vector<8x1xf32>
    %7 = arith.mulf %5, %6 : vector<8x1xf32>
    %8 = arith.mulf %4, %4 : vector<8x1xf32>
    %9 = arith.subf %7, %8 : vector<8x1xf32>
    %c0_5 = arith.constant 0 : index
    %c0_6 = arith.constant 0 : index
    %10 = vector.load %arg4[%c0_5, %c0_6] : memref<8x2xf32, #tpu.memory_space<vmem>>, vector<8x1xf32>
    %cst_7 = arith.constant 9.99999974E-6 : f32
    %11 = vector.broadcast %cst_7 : f32 to vector<8x1xf32>
    %12 = arith.addf %9, %11 : vector<8x1xf32>
    %13 = math.rsqrt %12 : vector<8x1xf32>
    %14 = arith.mulf %10, %13 : vector<8x1xf32>
    %c0_8 = arith.constant 0 : index
    %c1 = arith.constant 1 : index
    %15 = vector.load %arg4[%c0_8, %c1] : memref<8x2xf32, #tpu.memory_space<vmem>>, vector<8x1xf32>
    %16 = arith.mulf %4, %14 : vector<8x1xf32>
    %17 = arith.subf %15, %16 : vector<8x1xf32>
    %c0_9 = arith.constant 0 : index
    %c0_10 = arith.constant 0 : index
    %c0_11 = arith.constant 0 : index
    %18 = vector.load %arg2[%c0_9, %c0_10, %c0_11] : memref<1x8x128xbf16, #tpu.memory_space<vmem>>, vector<1x8x128xbf16>
    %19 = vector.shape_cast %18 : vector<1x8x128xbf16> to vector<8x128xbf16>
    %20 = arith.extf %19 : vector<8x128xbf16> to vector<8x128xf32>
    %21 = vector.broadcast %14 : vector<8x1xf32> to vector<8x128xf32>
    %22 = arith.mulf %20, %21 : vector<8x128xf32>
    %23 = vector.broadcast %17 : vector<8x1xf32> to vector<8x128xf32>
    %24 = arith.addf %22, %23 : vector<8x128xf32>
    %cst_12 = arith.constant 0.000000e+00 : f32
    %25 = vector.broadcast %cst_12 : f32 to vector<8x128xf32>
    %26 = arith.maximumf %24, %25 : vector<8x128xf32>
    %c0_13 = arith.constant 0 : index
    %c0_14 = arith.constant 0 : index
    %27 = vector.load %arg5[%c0_13, %c0_14] : memref<32x8xbf16, #tpu.memory_space<vmem>>, vector<32x8xbf16>
    %28 = arith.truncf %26 : vector<8x128xf32> to vector<8x128xbf16>
    %cst_15 = arith.constant dense<0.000000e+00> : vector<32x128xf32>
    %29 = tpu.matmul %27, %28, %cst_15 {dimension_numbers = #tpu.dot_dimension_numbers<[1], [0], [0], [1], [0, 0, 1, 1], [], []>} : vector<32x8xbf16>, vector<8x128xbf16>, vector<32x128xf32> -> vector<32x128xf32>
    %30 = arith.truncf %29 : vector<32x128xf32> to vector<32x128xbf16>
    %c0_16 = arith.constant 0 : index
    %c0_17 = arith.constant 0 : index
    %c0_18 = arith.constant 0 : index
    %31 = vector.load %arg6[%c0_16, %c0_17, %c0_18] : memref<1x32x128xbf16, #tpu.memory_space<vmem>>, vector<1x32x128xbf16>
    %32 = vector.shape_cast %31 : vector<1x32x128xbf16> to vector<32x128xbf16>
    %33 = vector.shape_cast %30 : vector<32x128xbf16> to vector<1x32x128xbf16>
    tpu.vector_store %arg6[%c0_16, %c0_17, %c0_18], %33 {strides = array<i32>} : memref<1x32x128xbf16, #tpu.memory_space<vmem>>, vector<1x32x128xbf16>,
    %cst_19 = arith.constant dense<0.000000e+00> : vector<32xf32>
    %34 = vector.multi_reduction <add>, %29, %cst_19 [1] : vector<32x128xf32> to vector<32xf32>
    %35 = vector.shape_cast %34 : vector<32xf32> to vector<32x1xf32>
    %36 = arith.mulf %29, %29 : vector<32x128xf32>
    %cst_20 = arith.constant dense<0.000000e+00> : vector<32xf32>
    %37 = vector.multi_reduction <add>, %36, %cst_20 [1] : vector<32x128xf32> to vector<32xf32>
    %38 = vector.shape_cast %37 : vector<32xf32> to vector<32x1xf32>
    %39 = tpu.concatenate %35, %38 in 1 : vector<32x1xf32>, vector<32x1xf32> -> vector<32x2xf32>
    %c0_21 = arith.constant 0 : index
    %c0_22 = arith.constant 0 : index
    %c0_23 = arith.constant 0 : index
    %c0_24 = arith.constant 0 : index
    %40 = vector.load %arg7[%c0_21, %c0_22, %c0_23, %c0_24] : memref<1x1x32x2xf32, #tpu.memory_space<vmem>>, vector<1x1x32x2xf32>
    %41 = vector.shape_cast %40 : vector<1x1x32x2xf32> to vector<32x2xf32>
    %42 = vector.shape_cast %39 : vector<32x2xf32> to vector<1x1x32x2xf32>
    tpu.vector_store %arg7[%c0_21, %c0_22, %c0_23, %c0_24], %42 {strides = array<i32>} : memref<1x1x32x2xf32, #tpu.memory_space<vmem>>, vector<1x1x32x2xf32>,
    return
  }
  func.func @transform_0(%arg0: i32, %arg1: i32) -> (i32, i32, i32) {
    %c0_i32 = arith.constant 0 : i32
    %c0_i32_0 = arith.constant 0 : i32
    return %arg0, %c0_i32, %arg1 : i32, i32, i32
  }
  func.func @transform_1(%arg0: i32, %arg1: i32) -> (i32, i32, i32, i32) {
    %c0_i32 = arith.constant 0 : i32
    %c0_i32_0 = arith.constant 0 : i32
    %c0_i32_1 = arith.constant 0 : i32
    %c0_i32_2 = arith.constant 0 : i32
    %c0_i32_3 = arith.constant 0 : i32
    return %c0_i32, %c0_i32_0, %c0_i32_1, %c0_i32_2 : i32, i32, i32, i32
  }
  func.func @transform_2(%arg0: i32, %arg1: i32) -> (i32, i32) {
    %c0_i32 = arith.constant 0 : i32
    %c0_i32_0 = arith.constant 0 : i32
    %c0_i32_1 = arith.constant 0 : i32
    return %c0_i32, %c0_i32_0 : i32, i32
  }
  func.func @transform_3(%arg0: i32, %arg1: i32) -> (i32, i32) {
    %c0_i32 = arith.constant 0 : i32
    %c0_i32_0 = arith.constant 0 : i32
    %c0_i32_1 = arith.constant 0 : i32
    return %c0_i32, %c0_i32_0 : i32, i32
  }
  func.func @transform_4(%arg0: i32, %arg1: i32) -> (i32, i32, i32) {
    %c0_i32 = arith.constant 0 : i32
    %c0_i32_0 = arith.constant 0 : i32
    return %arg0, %c0_i32, %arg1 : i32, i32, i32
  }
  func.func @transform_5(%arg0: i32, %arg1: i32) -> (i32, i32, i32, i32) {
    %c0_i32 = arith.constant 0 : i32
    %c0_i32_0 = arith.constant 0 : i32
    %c0_i32_1 = arith.constant 0 : i32
    return %arg0, %arg1, %c0_i32, %c0_i32_0 : i32, i32, i32, i32
  }
}

module attributes {stable_mosaic.version = 11 : i64} {
  func.func @bn_relu_conv3x3_stats_kernel(%arg0: i32, %arg1: memref<1x8x256xbf16, #tpu.memory_space<vmem>>, %arg2: memref<2x2x8x2xf32, #tpu.memory_space<vmem>>, %arg3: memref<8x2xf32, #tpu.memory_space<vmem>>, %arg4: memref<9x8x8xbf16, #tpu.memory_space<vmem>>, %arg5: memref<9x1x256xf32, #tpu.memory_space<vmem>>, %arg6: memref<1x8x256xbf16, #tpu.memory_space<vmem>>, %arg7: memref<1x1x8x2xf32, #tpu.memory_space<vmem>>) attributes {dimension_semantics = [#tpu.dimension_semantics<parallel>], iteration_bounds = array<i64: 2>, scalar_prefetch = 0 : i64, scratch_operands = 0 : i64, tpu.core_type = #tpu.core_type<tc>, window_params = [{transform_indices = @transform_0, window_bounds = array<i64: 1, 8, 256>}, {pipeline_mode = #tpu.pipeline_mode<synchronous>, transform_indices = @transform_1, window_bounds = array<i64: 2, 2, 8, 2>}, {pipeline_mode = #tpu.pipeline_mode<synchronous>, transform_indices = @transform_2, window_bounds = array<i64: 8, 2>}, {pipeline_mode = #tpu.pipeline_mode<synchronous>, transform_indices = @transform_3, window_bounds = array<i64: 9, 8, 8>}, {pipeline_mode = #tpu.pipeline_mode<synchronous>, transform_indices = @transform_4, window_bounds = array<i64: 9, 1, 256>}, {transform_indices = @transform_5, window_bounds = array<i64: 1, 8, 256>}, {transform_indices = @transform_6, window_bounds = array<i64: 1, 1, 8, 2>}]} {
    %c0 = arith.constant 0 : index
    %c0_0 = arith.constant 0 : index
    %c0_1 = arith.constant 0 : index
    %c0_2 = arith.constant 0 : index
    %0 = vector.load %arg2[%c0, %c0_0, %c0_1, %c0_2] : memref<2x2x8x2xf32, #tpu.memory_space<vmem>>, vector<2x2x8x2xf32>
    %cst = arith.constant dense<0.000000e+00> : vector<8x2xf32>
    %1 = vector.multi_reduction <add>, %0, %cst [0, 1] : vector<2x2x8x2xf32> to vector<8x2xf32>
    %2 = vector.extract_strided_slice %1 {offsets = [0, 0], sizes = [8, 1], strides = [1, 1]} : vector<8x2xf32> to vector<8x1xf32>
    %cst_3 = arith.constant 0.001953125 : f32
    %3 = vector.broadcast %cst_3 : f32 to vector<8x1xf32>
    %4 = arith.mulf %2, %3 : vector<8x1xf32>
    %5 = vector.extract_strided_slice %1 {offsets = [0, 1], sizes = [8, 1], strides = [1, 1]} : vector<8x2xf32> to vector<8x1xf32>
    %cst_4 = arith.constant 0.001953125 : f32
    %6 = vector.broadcast %cst_4 : f32 to vector<8x1xf32>
    %7 = arith.mulf %5, %6 : vector<8x1xf32>
    %8 = arith.mulf %4, %4 : vector<8x1xf32>
    %9 = arith.subf %7, %8 : vector<8x1xf32>
    %c0_5 = arith.constant 0 : index
    %c0_6 = arith.constant 0 : index
    %10 = vector.load %arg3[%c0_5, %c0_6] : memref<8x2xf32, #tpu.memory_space<vmem>>, vector<8x1xf32>
    %cst_7 = arith.constant 9.99999974E-6 : f32
    %11 = vector.broadcast %cst_7 : f32 to vector<8x1xf32>
    %12 = arith.addf %9, %11 : vector<8x1xf32>
    %13 = math.rsqrt %12 : vector<8x1xf32>
    %14 = arith.mulf %10, %13 : vector<8x1xf32>
    %c0_8 = arith.constant 0 : index
    %c1 = arith.constant 1 : index
    %15 = vector.load %arg3[%c0_8, %c1] : memref<8x2xf32, #tpu.memory_space<vmem>>, vector<8x1xf32>
    %16 = arith.mulf %4, %14 : vector<8x1xf32>
    %17 = arith.subf %15, %16 : vector<8x1xf32>
    %c0_9 = arith.constant 0 : index
    %c0_10 = arith.constant 0 : index
    %c0_11 = arith.constant 0 : index
    %18 = vector.load %arg1[%c0_9, %c0_10, %c0_11] : memref<1x8x256xbf16, #tpu.memory_space<vmem>>, vector<1x8x256xbf16>
    %19 = vector.shape_cast %18 : vector<1x8x256xbf16> to vector<8x256xbf16>
    %20 = arith.extf %19 : vector<8x256xbf16> to vector<8x256xf32>
    %21 = vector.broadcast %14 : vector<8x1xf32> to vector<8x256xf32>
    %22 = arith.mulf %20, %21 : vector<8x256xf32>
    %23 = vector.broadcast %17 : vector<8x1xf32> to vector<8x256xf32>
    %24 = arith.addf %22, %23 : vector<8x256xf32>
    %cst_12 = arith.constant 0.000000e+00 : f32
    %25 = vector.broadcast %cst_12 : f32 to vector<8x256xf32>
    %26 = arith.maximumf %24, %25 : vector<8x256xf32>
    %c17_i32 = arith.constant 17 : i32
    %27 = tpu.dynamic_rotate %26 by %c17_i32 dim 1 : vector<8x256xf32>, i32 -> vector<8x256xf32>
    %c0_13 = arith.constant 0 : index
    %c0_14 = arith.constant 0 : index
    %c0_15 = arith.constant 0 : index
    %28 = vector.load %arg5[%c0_13, %c0_14, %c0_15] : memref<9x1x256xf32, #tpu.memory_space<vmem>>, vector<1x1x256xf32>
    %29 = vector.shape_cast %28 : vector<1x1x256xf32> to vector<1x256xf32>
    %30 = vector.broadcast %29 : vector<1x256xf32> to vector<8x256xf32>
    %31 = arith.mulf %27, %30 : vector<8x256xf32>
    %32 = arith.truncf %31 : vector<8x256xf32> to vector<8x256xbf16>
    %c0_16 = arith.constant 0 : index
    %c0_17 = arith.constant 0 : index
    %c0_18 = arith.constant 0 : index
    %33 = vector.load %arg4[%c0_16, %c0_17, %c0_18] : memref<9x8x8xbf16, #tpu.memory_space<vmem>>, vector<1x8x8xbf16>
    %34 = vector.shape_cast %33 : vector<1x8x8xbf16> to vector<8x8xbf16>
    %cst_19 = arith.constant dense<0.000000e+00> : vector<8x256xf32>
    %35 = tpu.matmul %34, %32, %cst_19 {dimension_numbers = #tpu.dot_dimension_numbers<[1], [0], [0], [1], [0, 0, 1, 1], [], []>} : vector<8x8xbf16>, vector<8x256xbf16>, vector<8x256xf32> -> vector<8x256xf32>
    %c16_i32 = arith.constant 16 : i32
    %36 = tpu.dynamic_rotate %26 by %c16_i32 dim 1 : vector<8x256xf32>, i32 -> vector<8x256xf32>
    %c1_20 = arith.constant 1 : index
    %c0_21 = arith.constant 0 : index
    %c0_22 = arith.constant 0 : index
    %37 = vector.load %arg5[%c1_20, %c0_21, %c0_22] : memref<9x1x256xf32, #tpu.memory_space<vmem>>, vector<1x1x256xf32>
    %38 = vector.shape_cast %37 : vector<1x1x256xf32> to vector<1x256xf32>
    %39 = vector.broadcast %38 : vector<1x256xf32> to vector<8x256xf32>
    %40 = arith.mulf %36, %39 : vector<8x256xf32>
    %41 = arith.truncf %40 : vector<8x256xf32> to vector<8x256xbf16>
    %c1_23 = arith.constant 1 : index
    %c0_24 = arith.constant 0 : index
    %c0_25 = arith.constant 0 : index
    %42 = vector.load %arg4[%c1_23, %c0_24, %c0_25] : memref<9x8x8xbf16, #tpu.memory_space<vmem>>, vector<1x8x8xbf16>
    %43 = vector.shape_cast %42 : vector<1x8x8xbf16> to vector<8x8xbf16>
    %cst_26 = arith.constant dense<0.000000e+00> : vector<8x256xf32>
    %44 = tpu.matmul %43, %41, %cst_26 {dimension_numbers = #tpu.dot_dimension_numbers<[1], [0], [0], [1], [0, 0, 1, 1], [], []>} : vector<8x8xbf16>, vector<8x256xbf16>, vector<8x256xf32> -> vector<8x256xf32>
    %45 = arith.addf %35, %44 : vector<8x256xf32>
    %c15_i32 = arith.constant 15 : i32
    %46 = tpu.dynamic_rotate %26 by %c15_i32 dim 1 : vector<8x256xf32>, i32 -> vector<8x256xf32>
    %c2 = arith.constant 2 : index
    %c0_27 = arith.constant 0 : index
    %c0_28 = arith.constant 0 : index
    %47 = vector.load %arg5[%c2, %c0_27, %c0_28] : memref<9x1x256xf32, #tpu.memory_space<vmem>>, vector<1x1x256xf32>
    %48 = vector.shape_cast %47 : vector<1x1x256xf32> to vector<1x256xf32>
    %49 = vector.broadcast %48 : vector<1x256xf32> to vector<8x256xf32>
    %50 = arith.mulf %46, %49 : vector<8x256xf32>
    %51 = arith.truncf %50 : vector<8x256xf32> to vector<8x256xbf16>
    %c2_29 = arith.constant 2 : index
    %c0_30 = arith.constant 0 : index
    %c0_31 = arith.constant 0 : index
    %52 = vector.load %arg4[%c2_29, %c0_30, %c0_31] : memref<9x8x8xbf16, #tpu.memory_space<vmem>>, vector<1x8x8xbf16>
    %53 = vector.shape_cast %52 : vector<1x8x8xbf16> to vector<8x8xbf16>
    %cst_32 = arith.constant dense<0.000000e+00> : vector<8x256xf32>
    %54 = tpu.matmul %53, %51, %cst_32 {dimension_numbers = #tpu.dot_dimension_numbers<[1], [0], [0], [1], [0, 0, 1, 1], [], []>} : vector<8x8xbf16>, vector<8x256xbf16>, vector<8x256xf32> -> vector<8x256xf32>
    %55 = arith.addf %45, %54 : vector<8x256xf32>
    %c1_i32 = arith.constant 1 : i32
    %56 = tpu.dynamic_rotate %26 by %c1_i32 dim 1 : vector<8x256xf32>, i32 -> vector<8x256xf32>
    %c3 = arith.constant 3 : index
    %c0_33 = arith.constant 0 : index
    %c0_34 = arith.constant 0 : index
    %57 = vector.load %arg5[%c3, %c0_33, %c0_34] : memref<9x1x256xf32, #tpu.memory_space<vmem>>, vector<1x1x256xf32>
    %58 = vector.shape_cast %57 : vector<1x1x256xf32> to vector<1x256xf32>
    %59 = vector.broadcast %58 : vector<1x256xf32> to vector<8x256xf32>
    %60 = arith.mulf %56, %59 : vector<8x256xf32>
    %61 = arith.truncf %60 : vector<8x256xf32> to vector<8x256xbf16>
    %c3_35 = arith.constant 3 : index
    %c0_36 = arith.constant 0 : index
    %c0_37 = arith.constant 0 : index
    %62 = vector.load %arg4[%c3_35, %c0_36, %c0_37] : memref<9x8x8xbf16, #tpu.memory_space<vmem>>, vector<1x8x8xbf16>
    %63 = vector.shape_cast %62 : vector<1x8x8xbf16> to vector<8x8xbf16>
    %cst_38 = arith.constant dense<0.000000e+00> : vector<8x256xf32>
    %64 = tpu.matmul %63, %61, %cst_38 {dimension_numbers = #tpu.dot_dimension_numbers<[1], [0], [0], [1], [0, 0, 1, 1], [], []>} : vector<8x8xbf16>, vector<8x256xbf16>, vector<8x256xf32> -> vector<8x256xf32>
    %65 = arith.addf %55, %64 : vector<8x256xf32>
    %c4 = arith.constant 4 : index
    %c0_39 = arith.constant 0 : index
    %c0_40 = arith.constant 0 : index
    %66 = vector.load %arg5[%c4, %c0_39, %c0_40] : memref<9x1x256xf32, #tpu.memory_space<vmem>>, vector<1x1x256xf32>
    %67 = vector.shape_cast %66 : vector<1x1x256xf32> to vector<1x256xf32>
    %68 = vector.broadcast %67 : vector<1x256xf32> to vector<8x256xf32>
    %69 = arith.mulf %26, %68 : vector<8x256xf32>
    %70 = arith.truncf %69 : vector<8x256xf32> to vector<8x256xbf16>
    %c4_41 = arith.constant 4 : index
    %c0_42 = arith.constant 0 : index
    %c0_43 = arith.constant 0 : index
    %71 = vector.load %arg4[%c4_41, %c0_42, %c0_43] : memref<9x8x8xbf16, #tpu.memory_space<vmem>>, vector<1x8x8xbf16>
    %72 = vector.shape_cast %71 : vector<1x8x8xbf16> to vector<8x8xbf16>
    %cst_44 = arith.constant dense<0.000000e+00> : vector<8x256xf32>
    %73 = tpu.matmul %72, %70, %cst_44 {dimension_numbers = #tpu.dot_dimension_numbers<[1], [0], [0], [1], [0, 0, 1, 1], [], []>} : vector<8x8xbf16>, vector<8x256xbf16>, vector<8x256xf32> -> vector<8x256xf32>
    %74 = arith.addf %65, %73 : vector<8x256xf32>
    %c255_i32 = arith.constant 255 : i32
    %75 = tpu.dynamic_rotate %26 by %c255_i32 dim 1 : vector<8x256xf32>, i32 -> vector<8x256xf32>
    %c5 = arith.constant 5 : index
    %c0_45 = arith.constant 0 : index
    %c0_46 = arith.constant 0 : index
    %76 = vector.load %arg5[%c5, %c0_45, %c0_46] : memref<9x1x256xf32, #tpu.memory_space<vmem>>, vector<1x1x256xf32>
    %77 = vector.shape_cast %76 : vector<1x1x256xf32> to vector<1x256xf32>
    %78 = vector.broadcast %77 : vector<1x256xf32> to vector<8x256xf32>
    %79 = arith.mulf %75, %78 : vector<8x256xf32>
    %80 = arith.truncf %79 : vector<8x256xf32> to vector<8x256xbf16>
    %c5_47 = arith.constant 5 : index
    %c0_48 = arith.constant 0 : index
    %c0_49 = arith.constant 0 : index
    %81 = vector.load %arg4[%c5_47, %c0_48, %c0_49] : memref<9x8x8xbf16, #tpu.memory_space<vmem>>, vector<1x8x8xbf16>
    %82 = vector.shape_cast %81 : vector<1x8x8xbf16> to vector<8x8xbf16>
    %cst_50 = arith.constant dense<0.000000e+00> : vector<8x256xf32>
    %83 = tpu.matmul %82, %80, %cst_50 {dimension_numbers = #tpu.dot_dimension_numbers<[1], [0], [0], [1], [0, 0, 1, 1], [], []>} : vector<8x8xbf16>, vector<8x256xbf16>, vector<8x256xf32> -> vector<8x256xf32>
    %84 = arith.addf %74, %83 : vector<8x256xf32>
    %c241_i32 = arith.constant 241 : i32
    %85 = tpu.dynamic_rotate %26 by %c241_i32 dim 1 : vector<8x256xf32>, i32 -> vector<8x256xf32>
    %c6 = arith.constant 6 : index
    %c0_51 = arith.constant 0 : index
    %c0_52 = arith.constant 0 : index
    %86 = vector.load %arg5[%c6, %c0_51, %c0_52] : memref<9x1x256xf32, #tpu.memory_space<vmem>>, vector<1x1x256xf32>
    %87 = vector.shape_cast %86 : vector<1x1x256xf32> to vector<1x256xf32>
    %88 = vector.broadcast %87 : vector<1x256xf32> to vector<8x256xf32>
    %89 = arith.mulf %85, %88 : vector<8x256xf32>
    %90 = arith.truncf %89 : vector<8x256xf32> to vector<8x256xbf16>
    %c6_53 = arith.constant 6 : index
    %c0_54 = arith.constant 0 : index
    %c0_55 = arith.constant 0 : index
    %91 = vector.load %arg4[%c6_53, %c0_54, %c0_55] : memref<9x8x8xbf16, #tpu.memory_space<vmem>>, vector<1x8x8xbf16>
    %92 = vector.shape_cast %91 : vector<1x8x8xbf16> to vector<8x8xbf16>
    %cst_56 = arith.constant dense<0.000000e+00> : vector<8x256xf32>
    %93 = tpu.matmul %92, %90, %cst_56 {dimension_numbers = #tpu.dot_dimension_numbers<[1], [0], [0], [1], [0, 0, 1, 1], [], []>} : vector<8x8xbf16>, vector<8x256xbf16>, vector<8x256xf32> -> vector<8x256xf32>
    %94 = arith.addf %84, %93 : vector<8x256xf32>
    %c240_i32 = arith.constant 240 : i32
    %95 = tpu.dynamic_rotate %26 by %c240_i32 dim 1 : vector<8x256xf32>, i32 -> vector<8x256xf32>
    %c7 = arith.constant 7 : index
    %c0_57 = arith.constant 0 : index
    %c0_58 = arith.constant 0 : index
    %96 = vector.load %arg5[%c7, %c0_57, %c0_58] : memref<9x1x256xf32, #tpu.memory_space<vmem>>, vector<1x1x256xf32>
    %97 = vector.shape_cast %96 : vector<1x1x256xf32> to vector<1x256xf32>
    %98 = vector.broadcast %97 : vector<1x256xf32> to vector<8x256xf32>
    %99 = arith.mulf %95, %98 : vector<8x256xf32>
    %100 = arith.truncf %99 : vector<8x256xf32> to vector<8x256xbf16>
    %c7_59 = arith.constant 7 : index
    %c0_60 = arith.constant 0 : index
    %c0_61 = arith.constant 0 : index
    %101 = vector.load %arg4[%c7_59, %c0_60, %c0_61] : memref<9x8x8xbf16, #tpu.memory_space<vmem>>, vector<1x8x8xbf16>
    %102 = vector.shape_cast %101 : vector<1x8x8xbf16> to vector<8x8xbf16>
    %cst_62 = arith.constant dense<0.000000e+00> : vector<8x256xf32>
    %103 = tpu.matmul %102, %100, %cst_62 {dimension_numbers = #tpu.dot_dimension_numbers<[1], [0], [0], [1], [0, 0, 1, 1], [], []>} : vector<8x8xbf16>, vector<8x256xbf16>, vector<8x256xf32> -> vector<8x256xf32>
    %104 = arith.addf %94, %103 : vector<8x256xf32>
    %c239_i32 = arith.constant 239 : i32
    %105 = tpu.dynamic_rotate %26 by %c239_i32 dim 1 : vector<8x256xf32>, i32 -> vector<8x256xf32>
    %c8 = arith.constant 8 : index
    %c0_63 = arith.constant 0 : index
    %c0_64 = arith.constant 0 : index
    %106 = vector.load %arg5[%c8, %c0_63, %c0_64] : memref<9x1x256xf32, #tpu.memory_space<vmem>>, vector<1x1x256xf32>
    %107 = vector.shape_cast %106 : vector<1x1x256xf32> to vector<1x256xf32>
    %108 = vector.broadcast %107 : vector<1x256xf32> to vector<8x256xf32>
    %109 = arith.mulf %105, %108 : vector<8x256xf32>
    %110 = arith.truncf %109 : vector<8x256xf32> to vector<8x256xbf16>
    %c8_65 = arith.constant 8 : index
    %c0_66 = arith.constant 0 : index
    %c0_67 = arith.constant 0 : index
    %111 = vector.load %arg4[%c8_65, %c0_66, %c0_67] : memref<9x8x8xbf16, #tpu.memory_space<vmem>>, vector<1x8x8xbf16>
    %112 = vector.shape_cast %111 : vector<1x8x8xbf16> to vector<8x8xbf16>
    %cst_68 = arith.constant dense<0.000000e+00> : vector<8x256xf32>
    %113 = tpu.matmul %112, %110, %cst_68 {dimension_numbers = #tpu.dot_dimension_numbers<[1], [0], [0], [1], [0, 0, 1, 1], [], []>} : vector<8x8xbf16>, vector<8x256xbf16>, vector<8x256xf32> -> vector<8x256xf32>
    %114 = arith.addf %104, %113 : vector<8x256xf32>
    %115 = arith.truncf %114 : vector<8x256xf32> to vector<8x256xbf16>
    %c0_69 = arith.constant 0 : index
    %c0_70 = arith.constant 0 : index
    %c0_71 = arith.constant 0 : index
    %116 = vector.load %arg6[%c0_69, %c0_70, %c0_71] : memref<1x8x256xbf16, #tpu.memory_space<vmem>>, vector<1x8x256xbf16>
    %117 = vector.shape_cast %116 : vector<1x8x256xbf16> to vector<8x256xbf16>
    %118 = vector.shape_cast %115 : vector<8x256xbf16> to vector<1x8x256xbf16>
    tpu.vector_store %arg6[%c0_69, %c0_70, %c0_71], %118 {strides = array<i32>} : memref<1x8x256xbf16, #tpu.memory_space<vmem>>, vector<1x8x256xbf16>,
    %cst_72 = arith.constant dense<0.000000e+00> : vector<8xf32>
    %119 = vector.multi_reduction <add>, %114, %cst_72 [1] : vector<8x256xf32> to vector<8xf32>
    %120 = vector.shape_cast %119 : vector<8xf32> to vector<8x1xf32>
    %121 = arith.mulf %114, %114 : vector<8x256xf32>
    %cst_73 = arith.constant dense<0.000000e+00> : vector<8xf32>
    %122 = vector.multi_reduction <add>, %121, %cst_73 [1] : vector<8x256xf32> to vector<8xf32>
    %123 = vector.shape_cast %122 : vector<8xf32> to vector<8x1xf32>
    %124 = tpu.concatenate %120, %123 in 1 : vector<8x1xf32>, vector<8x1xf32> -> vector<8x2xf32>
    %c0_74 = arith.constant 0 : index
    %c0_75 = arith.constant 0 : index
    %c0_76 = arith.constant 0 : index
    %c0_77 = arith.constant 0 : index
    %125 = vector.load %arg7[%c0_74, %c0_75, %c0_76, %c0_77] : memref<1x1x8x2xf32, #tpu.memory_space<vmem>>, vector<1x1x8x2xf32>
    %126 = vector.shape_cast %125 : vector<1x1x8x2xf32> to vector<8x2xf32>
    %127 = vector.shape_cast %124 : vector<8x2xf32> to vector<1x1x8x2xf32>
    tpu.vector_store %arg7[%c0_74, %c0_75, %c0_76, %c0_77], %127 {strides = array<i32>} : memref<1x1x8x2xf32, #tpu.memory_space<vmem>>, vector<1x1x8x2xf32>,
    return
  }
  func.func @transform_0(%arg0: i32) -> (i32, i32, i32) {
    %c0_i32 = arith.constant 0 : i32
    %c0_i32_0 = arith.constant 0 : i32
    %c0_i32_1 = arith.constant 0 : i32
    return %arg0, %c0_i32, %c0_i32_0 : i32, i32, i32
  }
  func.func @transform_1(%arg0: i32) -> (i32, i32, i32, i32) {
    %c0_i32 = arith.constant 0 : i32
    %c0_i32_0 = arith.constant 0 : i32
    %c0_i32_1 = arith.constant 0 : i32
    %c0_i32_2 = arith.constant 0 : i32
    %c0_i32_3 = arith.constant 0 : i32
    return %c0_i32, %c0_i32_0, %c0_i32_1, %c0_i32_2 : i32, i32, i32, i32
  }
  func.func @transform_2(%arg0: i32) -> (i32, i32) {
    %c0_i32 = arith.constant 0 : i32
    %c0_i32_0 = arith.constant 0 : i32
    %c0_i32_1 = arith.constant 0 : i32
    return %c0_i32, %c0_i32_0 : i32, i32
  }
  func.func @transform_3(%arg0: i32) -> (i32, i32, i32) {
    %c0_i32 = arith.constant 0 : i32
    %c0_i32_0 = arith.constant 0 : i32
    %c0_i32_1 = arith.constant 0 : i32
    %c0_i32_2 = arith.constant 0 : i32
    return %c0_i32, %c0_i32_0, %c0_i32_1 : i32, i32, i32
  }
  func.func @transform_4(%arg0: i32) -> (i32, i32, i32) {
    %c0_i32 = arith.constant 0 : i32
    %c0_i32_0 = arith.constant 0 : i32
    %c0_i32_1 = arith.constant 0 : i32
    %c0_i32_2 = arith.constant 0 : i32
    return %c0_i32, %c0_i32_0, %c0_i32_1 : i32, i32, i32
  }
  func.func @transform_5(%arg0: i32) -> (i32, i32, i32) {
    %c0_i32 = arith.constant 0 : i32
    %c0_i32_0 = arith.constant 0 : i32
    %c0_i32_1 = arith.constant 0 : i32
    return %arg0, %c0_i32, %c0_i32_0 : i32, i32, i32
  }
  func.func @transform_6(%arg0: i32) -> (i32, i32, i32, i32) {
    %c0_i32 = arith.constant 0 : i32
    %c0_i32_0 = arith.constant 0 : i32
    %c0_i32_1 = arith.constant 0 : i32
    %c0_i32_2 = arith.constant 0 : i32
    return %arg0, %c0_i32, %c0_i32_0, %c0_i32_1 : i32, i32, i32, i32
  }
}

module attributes {stable_mosaic.version = 11 : i64} {
  func.func @bn_add_relu_kernel(%arg0: i32, %arg1: i32, %arg2: memref<1x32x128xbf16, #tpu.memory_space<vmem>>, %arg3: memref<2x2x32x2xf32, #tpu.memory_space<vmem>>, %arg4: memref<32x2xf32, #tpu.memory_space<vmem>>, %arg5: memref<1x32x128xf32, #tpu.memory_space<vmem>>, %arg6: memref<1x32x128xf32, #tpu.memory_space<vmem>>) attributes {dimension_semantics = [#tpu.dimension_semantics<parallel>, #tpu.dimension_semantics<parallel>], iteration_bounds = array<i64: 2, 2>, scalar_prefetch = 0 : i64, scratch_operands = 0 : i64, tpu.core_type = #tpu.core_type<tc>, window_params = [{transform_indices = @transform_0, window_bounds = array<i64: 1, 32, 128>}, {pipeline_mode = #tpu.pipeline_mode<synchronous>, transform_indices = @transform_1, window_bounds = array<i64: 2, 2, 32, 2>}, {pipeline_mode = #tpu.pipeline_mode<synchronous>, transform_indices = @transform_2, window_bounds = array<i64: 32, 2>}, {transform_indices = @transform_3, window_bounds = array<i64: 1, 32, 128>}, {transform_indices = @transform_4, window_bounds = array<i64: 1, 32, 128>}]} {
    %c0 = arith.constant 0 : index
    %c0_0 = arith.constant 0 : index
    %c0_1 = arith.constant 0 : index
    %c0_2 = arith.constant 0 : index
    %0 = vector.load %arg3[%c0, %c0_0, %c0_1, %c0_2] : memref<2x2x32x2xf32, #tpu.memory_space<vmem>>, vector<2x2x32x2xf32>
    %cst = arith.constant dense<0.000000e+00> : vector<32x2xf32>
    %1 = vector.multi_reduction <add>, %0, %cst [0, 1] : vector<2x2x32x2xf32> to vector<32x2xf32>
    %2 = vector.extract_strided_slice %1 {offsets = [0, 0], sizes = [32, 1], strides = [1, 1]} : vector<32x2xf32> to vector<32x1xf32>
    %cst_3 = arith.constant 0.001953125 : f32
    %3 = vector.broadcast %cst_3 : f32 to vector<32x1xf32>
    %4 = arith.mulf %2, %3 : vector<32x1xf32>
    %5 = vector.extract_strided_slice %1 {offsets = [0, 1], sizes = [32, 1], strides = [1, 1]} : vector<32x2xf32> to vector<32x1xf32>
    %cst_4 = arith.constant 0.001953125 : f32
    %6 = vector.broadcast %cst_4 : f32 to vector<32x1xf32>
    %7 = arith.mulf %5, %6 : vector<32x1xf32>
    %8 = arith.mulf %4, %4 : vector<32x1xf32>
    %9 = arith.subf %7, %8 : vector<32x1xf32>
    %c0_5 = arith.constant 0 : index
    %c0_6 = arith.constant 0 : index
    %10 = vector.load %arg4[%c0_5, %c0_6] : memref<32x2xf32, #tpu.memory_space<vmem>>, vector<32x1xf32>
    %cst_7 = arith.constant 9.99999974E-6 : f32
    %11 = vector.broadcast %cst_7 : f32 to vector<32x1xf32>
    %12 = arith.addf %9, %11 : vector<32x1xf32>
    %13 = math.rsqrt %12 : vector<32x1xf32>
    %14 = arith.mulf %10, %13 : vector<32x1xf32>
    %c0_8 = arith.constant 0 : index
    %c1 = arith.constant 1 : index
    %15 = vector.load %arg4[%c0_8, %c1] : memref<32x2xf32, #tpu.memory_space<vmem>>, vector<32x1xf32>
    %16 = arith.mulf %4, %14 : vector<32x1xf32>
    %17 = arith.subf %15, %16 : vector<32x1xf32>
    %c0_9 = arith.constant 0 : index
    %c0_10 = arith.constant 0 : index
    %c0_11 = arith.constant 0 : index
    %18 = vector.load %arg2[%c0_9, %c0_10, %c0_11] : memref<1x32x128xbf16, #tpu.memory_space<vmem>>, vector<1x32x128xbf16>
    %19 = vector.shape_cast %18 : vector<1x32x128xbf16> to vector<32x128xbf16>
    %20 = arith.extf %19 : vector<32x128xbf16> to vector<32x128xf32>
    %21 = vector.broadcast %14 : vector<32x1xf32> to vector<32x128xf32>
    %22 = arith.mulf %20, %21 : vector<32x128xf32>
    %23 = vector.broadcast %17 : vector<32x1xf32> to vector<32x128xf32>
    %24 = arith.addf %22, %23 : vector<32x128xf32>
    %c0_12 = arith.constant 0 : index
    %c0_13 = arith.constant 0 : index
    %c0_14 = arith.constant 0 : index
    %25 = vector.load %arg5[%c0_12, %c0_13, %c0_14] : memref<1x32x128xf32, #tpu.memory_space<vmem>>, vector<1x32x128xf32>
    %26 = vector.shape_cast %25 : vector<1x32x128xf32> to vector<32x128xf32>
    %27 = arith.addf %24, %26 : vector<32x128xf32>
    %cst_15 = arith.constant 0.000000e+00 : f32
    %28 = vector.broadcast %cst_15 : f32 to vector<32x128xf32>
    %29 = arith.maximumf %27, %28 : vector<32x128xf32>
    %c0_16 = arith.constant 0 : index
    %c0_17 = arith.constant 0 : index
    %c0_18 = arith.constant 0 : index
    %30 = vector.load %arg6[%c0_16, %c0_17, %c0_18] : memref<1x32x128xf32, #tpu.memory_space<vmem>>, vector<1x32x128xf32>
    %31 = vector.shape_cast %30 : vector<1x32x128xf32> to vector<32x128xf32>
    %32 = vector.shape_cast %29 : vector<32x128xf32> to vector<1x32x128xf32>
    tpu.vector_store %arg6[%c0_16, %c0_17, %c0_18], %32 {strides = array<i32>} : memref<1x32x128xf32, #tpu.memory_space<vmem>>, vector<1x32x128xf32>,
    return
  }
  func.func @transform_0(%arg0: i32, %arg1: i32) -> (i32, i32, i32) {
    %c0_i32 = arith.constant 0 : i32
    %c0_i32_0 = arith.constant 0 : i32
    return %arg0, %c0_i32, %arg1 : i32, i32, i32
  }
  func.func @transform_1(%arg0: i32, %arg1: i32) -> (i32, i32, i32, i32) {
    %c0_i32 = arith.constant 0 : i32
    %c0_i32_0 = arith.constant 0 : i32
    %c0_i32_1 = arith.constant 0 : i32
    %c0_i32_2 = arith.constant 0 : i32
    %c0_i32_3 = arith.constant 0 : i32
    return %c0_i32, %c0_i32_0, %c0_i32_1, %c0_i32_2 : i32, i32, i32, i32
  }
  func.func @transform_2(%arg0: i32, %arg1: i32) -> (i32, i32) {
    %c0_i32 = arith.constant 0 : i32
    %c0_i32_0 = arith.constant 0 : i32
    %c0_i32_1 = arith.constant 0 : i32
    return %c0_i32, %c0_i32_0 : i32, i32
  }
  func.func @transform_3(%arg0: i32, %arg1: i32) -> (i32, i32, i32) {
    %c0_i32 = arith.constant 0 : i32
    %c0_i32_0 = arith.constant 0 : i32
    return %arg0, %c0_i32, %arg1 : i32, i32, i32
  }
  func.func @transform_4(%arg0: i32, %arg1: i32) -> (i32, i32, i32) {
    %c0_i32 = arith.constant 0 : i32
    %c0_i32_0 = arith.constant 0 : i32
    return %arg0, %c0_i32, %arg1 : i32, i32, i32
  }
}

</mosaic_0001>

<bundles_post_ra>
// kernel: bottleneck_forward.4
= control target key start
LH: loop header
LB: loop body
LE: loop exit
PB: predicated region body
PF: predicated region fallthrough
CT: control target
= control target key end

     0   :  { %s644_s12 = smov 0   ;;  %s646_s13 = smov 0   ;;  %s741_s0 = inlined_call_operand.vmem [shape: bf16[2,32,256], index: 0, kind: input, shape index: {}]   ;;  %s742_s1 = inlined_call_operand.vmem [shape: bf16[8,32], index: 1, kind: input, shape index: {}]   ;;  %s743_s2 = inlined_call_operand.vmem [shape: bf16[2,8,256], index: 2, kind: output, shape index: {0}]   ;;  %s744_s3 = inlined_call_operand.vmem [shape: f32[2,2,8,2], index: 3, kind: output, shape index: {1}]  }
   0x1   :  { %s648_s14 = smov 0   ;;  %s650_s15 = smov 0  }
   0x2   :  { %s652_s16 = smov 0   ;;  %s654_s17 = smov 0  }
   0x3   :  { %s656_s18 = smov 0  }
   0x4 LB: > { %s23_s19 = sadd.s32 1, %s612_s16  ;;  %s26_s20 = sadd.s32 1, %s616_s17  ;;  %s620_s18 = sphi %s656_s18, %s14_s18   ;;  %s616_s17 = sphi %s654_s17, %s750_s17   ;;  %s612_s16 = sphi %s652_s16, %s749_s16   ;;  %s608_s15 = sphi %s650_s15, %s748_s15   ;;  %s604_s14 = sphi %s648_s14, %s747_s14   ;;  %s600_s13 = sphi %s646_s13, %s746_s13   ;;  %s596_s12 = sphi %s644_s12, %s745_s12  }
   0x5   : > { %p24_p0 = scmp.ge.s32.totalorder %s23_s19, 2  ;;  %p42_p1 = scmp.ne.s32.totalorder %s600_s13, %s596_s12 }
   0x6   : > { %p43_p2 = scmp.eq.s32.totalorder %s620_s18, 0  ;;  %s35_s24 = sadd.s32 1, %s600_s13 }
   0x7   : > { %s752_s19 = smov (%p24_p0, %s23_s19), 0  ;;  %s754_s20 = smov (!%p24_p0, %s26_s20), %s616_s17 }
   0x8   : > { %p44_p3 = por %p43_p2, %p42_p1  ;;  %p28_p4 = scmp.ge.s32.totalorder %s754_s20, 2 }
   0x9   : > { %s31_s21 = ssub.s32 %s612_s16, %s752_s19  ;;  %p480_p6 = scmp.ge.s32.totalorder %s620_s18, 4 }
   0xa   : > { %s756_s20 = smov (%p28_p4, %s754_s20), 0 }
   0xb   : > { %s30_s22 = ssub.s32 %s616_s17, %s756_s20  ;;  %148 = sbr.rel (%p480_p6) target bundleno = 26 (0x1a), region = 20 }
   0xc   : > { %s32_s23 = sor.u32 %s31_s21, %s30_s22 }
   0xd   : > { %p33_p5 = scmp.eq.s32.totalorder %s32_s23, 0 }
   0xf   : > { %s695_s25 = scalar_select %p33_p5, %s600_s13, %s35_s24  }
  0x12   : > { %151 = sbr.rel (!%p44_p3) target bundleno = 26 (0x1a), region = 24  ;;  %s153_s26 = sand.u32 (%p44_p3), 1, %s600_s13  }
  0x13   : > { %s482_s27 = sshll.u32 (%p44_p3), %s616_s17, 3  ;;  %s481_s28 = sshll.u32 (%p44_p3), %s153_s26, 4 }
  0x14   : > { %s157_s29 = sadd.s32 (%p44_p3), %s612_s16, %s482_s27  ;;  %s155_s7 = scalar_lea.vmem (%p44_p3), [#allocation2], %s481_s28 }
  0x15   : > { %s483_s30 = sshll.u32 (%p44_p3), %s157_s29, 2 }
  0x16   : > { %s159_s6 = scalar_lea.vmem (%p44_p3), %s741_s0, %s483_s30 }
  0x17   : > { %v175_v0 = vld [vmem:[%s159_s6] sm:$0xf] (%p44_p3)  ;;  %v177_v1 = vld [vmem:[%s159_s6 + $0x8] sm:$0xf] (%p44_p3)  ;;  %v179_v2 = vld [vmem:[%s159_s6 + $0x10] sm:$0xf] (%p44_p3) }
  0x18   : > { %176 = vst [vmem:[%s155_s7] sm:$0xf] (%p44_p3), %v175_v0  ;;  %178 = vst [vmem:[%s155_s7 + $0x4] sm:$0xf] (%p44_p3), %v177_v1  ;;  %v181_v3 = vld [vmem:[%s159_s6 + $0x18] sm:$0xf] (%p44_p3) }
  0x19   : > { %180 = vst [vmem:[%s155_s7 + $0x8] sm:$0xf] %v179_v2  ;;  %182 = vst [vmem:[%s155_s7 + $0xc] sm:$0xf] %v181_v3 }
  0x1a PF: > { %p484_p7 = scmp.ge.s32.totalorder %s620_s18, 1  ;;  %p212_p8 = scmp.lt.s32.totalorder %s620_s18, 5 }
  0x1c   : > { %p213_p9 = pnand %p484_p7, %p212_p8 }
  0x1d   : > { %s219_s8 = sand.u32 (!%p213_p9), 1, %s596_s12   ;;  %v622_v4 = vmov (!%p213_p9), 0.0   ;;  %vm623_vm0 = vmmov (!%p213_p9), 0   ;;  %v270_v7 = vld [vmem:[%s742_s1] sm:$0xf] (!%p213_p9)  ;;  %vm287_vm1 = vcmask (!%p213_p9), 261120  }
  0x1e   : > { %216 = sbr.rel (%p213_p9) target bundleno = 400 (0x190), region = 65  ;;  %498 = vmatprep.subr.bf16.mxu0 (!%p213_p9), %v622_v4  ;;  %s485_s9 = sshll.u32 (!%p213_p9), %s219_s8, 4  ;;  %502 = vmatprep.mubr.msk.bf16.mxu0 (!%p213_p9), %vm623_vm0, %v622_v4  ;;  %vm338_vm2 = vcmask (!%p213_p9), 7168   ;;  %vm340_vm3 = vcmask (!%p213_p9), 15360  }
  0x1f   : > { %s221_s10 = scalar_lea.vmem (!%p213_p9), [#allocation2], %s485_s9  ;;  %p253_p10 = scmp.lt.s32.totalorder (!%p213_p9), %s608_s15, 1 }
  0x20   : > { %v564_v5 = vld [vmem:[%s221_s10] sm:$0xff] (!%p213_p9)   ;;  %v565_v6 = vld [vmem:[%s221_s10 + $0x8] sm:$0xff] (!%p213_p9)   ;;  %p255_p11 = scmp.lt.s32.totalorder (!%p213_p9), %s604_s14, 1 }
  0x21   : > { %499 = vmatpush3.bf16.msra.mxu0 (!%p213_p9), %v564_v5 }
  0x22   : > { %500 = vmatprep.subr.bf16.mxu0 (!%p213_p9), %v622_v4 }
  0x25   : > { %501 = vmatpush3.bf16.msra.mxu0 %v565_v6  ;;  %s758_s15 = smov (!%p253_p10, %s608_s15), 1  ;;  %s760_s14 = smov (!%p255_p11, %s604_s14), 1 }
  0x26   : > { %s486_s12 = sshll.u32 %s758_s15, 1 }
  0x27   : > { %s258_s22 = sadd.s32 %s486_s12, %s760_s14 }
  0x28   : > { %503 = vmatmul.mubr.msk.bf16.vlgmr.msra.gmra.mrb[0].mxu0 %vm287_vm1, %v270_v7  ;;  %s487_s23 = sshll.u32 %s258_s22, 2  ;;  %s489_s28 = sshll.u32 %s258_s22, 3 }
  0x29   : > { %s260_s27 = scalar_lea.vmem %s743_s2, %s487_s23  ;;  %s268_s14 = scalar_lea.vmem %s744_s3, %s489_s28 }
  0xfb   : > { %v325_v8 = vpop.f32.mrb[0].mxu0 }
  0xfc   : > { %v331_v9 = vpack.c.bf16 %v325_v8, %v325_v8  ;;  %333 = vadd.xlane.f32.xlu0 %v325_v8  ;;  %v504_v10 = vpop.f32.mrb[1].mxu0  ;;  %v335_v13 = vmul.f32 %v325_v8, %v325_v8 }
  0xfd   : > { %v328_v11 = vpop.f32.mrb[2].mxu0 }
  0xfe   : > { %332 = vst [vmem:[%s260_s27] sm:$0xf] %v331_v9  ;;  %v505_v12 = vpop.f32.mrb[3].mxu0 }
 0x100   : > { %336 = vadd.xlane.f32.xlu0 %v335_v13 }
 0x189   : > { %v334_v14 = vpop.xlane.xlu0 %333 }
 0x18d   : > { %v337_v15 = vpop.xlane.xlu0 %336 }
 0x18e   : > { %v339_v16 = vsel %vm338_vm2, %v334_v14, %v337_v15 }
 0x18f   : > { %341 = vst.msk [vmem:[%s268_s14] sm:$0xff] %vm340_vm3, %v339_v16 }
 0x190 PF: > { %s14_s18 = sadd.s32 1, %s620_s18   ;;  %s745_s12 = smov %s600_s13 }
 0x191   : > { %p11_p12 = scmp.ge.s32.totalorder %s14_s18, 6   ;;  %s746_s13 = smov %s695_s25 }
 0x192   : > { %s747_s14 = smov %s612_s16  ;;  %s748_s15 = smov %s616_s17 }
 0x193   : > { %s749_s16 = smov %s752_s19  ;;  %s750_s17 = smov %s756_s20 }
 0x194   :  { %13 = sbr.rel (!%p11_p12) target bundleno = 4 (0x4), region = 116 }

// kernel: bottleneck_forward.6
= control target key start
LH: loop header
LB: loop body
LE: loop exit
PB: predicated region body
PF: predicated region fallthrough
CT: control target
= control target key end

     0   :  { %s824_s18 = smov 0   ;;  %s826_s19 = smov 0   ;;  %s961_s0 = inlined_call_operand.vmem [shape: bf16[2,8,256], index: 0, kind: input, shape index: {}]   ;;  %s962_s1 = inlined_call_operand.vmem [shape: f32[2,1,8,2], index: 1, kind: input, shape index: {}]   ;;  %s963_s2 = inlined_call_operand.vmem [shape: f32[8,2], index: 2, kind: input, shape index: {}]   ;;  %s964_s3 = inlined_call_operand.vmem [shape: bf16[32,8], index: 3, kind: input, shape index: {}]   ;;  %s965_s4 = inlined_call_operand.vmem [shape: bf16[2,32,256], index: 4, kind: output, shape index: {0}]   ;;  %s966_s5 = inlined_call_operand.vmem [shape: f32[2,2,32,2], index: 5, kind: output, shape index: {1}]  }
   0x1   :  { %s828_s20 = smov 0   ;;  %s830_s21 = smov 0  }
   0x2   :  { %s832_s22 = smov 0   ;;  %s834_s23 = smov 0  }
   0x3   :  { %s836_s24 = smov 0  }
   0x4 LB: > { %s25_s25 = sadd.s32 1, %s780_s22  ;;  %s28_s26 = sadd.s32 1, %s784_s23  ;;  %s788_s24 = sphi %s836_s24, %s16_s24   ;;  %s784_s23 = sphi %s834_s23, %s973_s23   ;;  %s780_s22 = sphi %s832_s22, %s972_s22   ;;  %s776_s21 = sphi %s830_s21, %s971_s21   ;;  %s772_s20 = sphi %s828_s20, %s970_s20   ;;  %s768_s19 = sphi %s826_s19, %s969_s19   ;;  %s764_s18 = sphi %s824_s18, %s968_s18  }
   0x5   : > { %p26_p0 = scmp.ge.s32.totalorder %s25_s25, 2  ;;  %s619_s27 = sadd.s32 4294967295, %s788_s24  }
   0x6   : > { %p138_p1 = scmp.ne.s32.totalorder %s768_s19, %s764_s18  ;;  %p139_p2 = scmp.eq.s32.totalorder %s619_s27, 3 }
   0x7   : > { %s975_s25 = smov (%p26_p0, %s25_s25), 0  ;;  %s977_s26 = smov (!%p26_p0, %s28_s26), %s784_s23 }
   0x8   : > { %s124_s28 = ssub.s32 %s780_s22, %s975_s25  ;;  %p30_p3 = scmp.ge.s32.totalorder %s977_s26, 2 }
   0x9   : > { %p623_p4 = scmp.ge.s32.totalorder %s788_s24, 1  ;;  %p870_p5 = por %p139_p2, %p138_p1 }
   0xa   : > { %p211_p6 = scmp.lt.s32.totalorder %s788_s24, 5  ;;  %s979_s26 = smov (%p30_p3, %s977_s26), 0 }
   0xb   : > { %s123_s30 = ssub.s32 %s784_s23, %s979_s26  ;;  %s128_s7 = sadd.s32 1, %s768_s19 }
   0xc   : > { %p212_p7 = pnand %p623_p4, %p211_p6  ;;  %s125_s6 = sor.u32 %s124_s28, %s123_s30 }
   0xd   : > { %p126_p8 = scmp.eq.s32.totalorder %s125_s6, 0  ;;  %v268_v0 = vld [vmem:[%s962_s1] sm:$0xff] (!%p212_p7)  ;;  %v269_v1 = vld [vmem:[%s962_s1 + $0x8] sm:$0xff] (!%p212_p7)  ;;  %vm270_vm0 = vcmask (!%p212_p7), 15360   ;;  %s790_s13 = smov (!%p212_p7), 1   ;;  %v791_v10 = vmov (!%p212_p7), 0  }
   0xe   : > { %215 = sbr.rel (%p212_p7) target bundleno = 896 (0x380), region = 36  ;;  %v271_v2 = vsel (!%p212_p7), %vm270_vm0, %v268_v0, 0.0  ;;  %v272_v3 = vsel (!%p212_p7), %vm270_vm0, %v269_v1, 0.0  ;;  %728 = vset.pattern.permute.xlu1 (!%p212_p7), %v791_v10  ;;  %s792_s14 = smov (!%p212_p7), 127   ;;  %v793_v12 = vmov (!%p212_p7), 1   ;;  %v281_v13 = vld [vmem:[%s963_s2] sm:$0xff] (!%p212_p7) }
   0xf   : > { %s881_s8 = scalar_select %p126_p8, %s768_s19, %s128_s7  }
  0x10   : > { %v273_v4 = vadd.f32 (!%p212_p7), %v272_v3, %v271_v2  ;;  %729 = vset.pattern.permute.xlu0 (!%p212_p7), %v793_v12  ;;  %v730_v19 = vld [vmem:[%s964_s3] sm:$0xff] (!%p212_p7)   ;;  %vm325_vm1 = vcmask (!%p212_p7), 64512   ;;  %p250_p9 = scmp.lt.s32.totalorder (!%p212_p7), %s776_s21, 1  ;;  %p252_p10 = scmp.lt.s32.totalorder (!%p212_p7), %s772_s20, 1  ;;  %vm332_vm2 = vcmask (!%p212_p7), 1043456   ;;  %v731_v29 = vld [vmem:[%s964_s3 + $0x8] sm:$0xff] (!%p212_p7)  }
  0x11   : > { %663 = vmatprep.mubr.msk.bf16.mxu0 (!%p212_p7), %vm325_vm1, %v730_v19  ;;  %s236_s15 = sand.u32 (!%p212_p7), 1, %s764_s18   ;;  %vm425_vm3 = vcmask (!%p212_p7), 7168  }
  0x12   : > { %v274_v5 = vmul.f32 (!%p212_p7), 0.001953125, %v273_v4  ;;  %s624_s16 = sshll.u32 (!%p212_p7), %s236_s15, 4 }
  0x13   : > { %s916_s17 = scalar_lea.vmem (!%p212_p7), [#allocation2], %s624_s16 }
  0x14   : > { %v275_v6 = vmul.f32 (!%p212_p7), %v274_v5, %v274_v5 }
  0x15   : > { %s901_s28 = scalar_select %p250_p9, %s776_s21, 1 }
  0x16   : > { %277 = vrot.lane.b32.xlu0 %v275_v6, %s790_s13  ;;  %s904_s30 = scalar_select %p252_p10, %s772_s20, 1 }
  0x17   : > { %s625_s6 = sshll.u32 %s901_s28, 1  ;;  %s628_s27 = sshll.u32 %s901_s28, 3 }
  0x18   : > { %s255_s7 = sadd.s32 %s625_s6, %s904_s30  ;;  %s627_s18 = sshll.u32 %s904_s30, 2 }
  0x19   : > { %s626_s9 = sshll.u32 %s255_s7, 2  ;;  %s264_s6 = sadd.s32 %s628_s27, %s627_s18 }
  0x1a   : > { %s257_s12 = scalar_lea.vmem %s961_s0, %s626_s9  ;;  %s629_s7 = sshll.u32 %s264_s6, 3 }
  0x1b   : > { %v295_v20 = vld [vmem:[%s257_s12] sm:$0xf]  ;;  %s266_s11 = scalar_lea.vmem %s966_s5, %s629_s7  ;;  %s639_s28 = sshll.u32 (%p870_p5), %s776_s21, 3 }
  0x1c   : > { %v296_v21 = vunpack.c.l.bf16 %v295_v20  ;;  %s451_s30 = sadd.s32 (%p870_p5), %s772_s20, %s639_s28 }
  0x1d   : > { %s640_s12 = sshll.u32 (%p870_p5), %s451_s30, 2 }
  0x1e   : > { %s453_s15 = scalar_lea.vmem (%p870_p5), %s965_s4, %s640_s12 }
  0x88   : > { %v278_v7 = vpop.permute.xlu0 %277 }
  0x89   : > { %v280_v8 = vsub.f32 %v274_v5, %v278_v7 }
  0x8b   : > { %v282_v9 = vadd.f32 1e-05, %v280_v8 }
  0x8d   : > { %732 = vrsqrt.f32 %v282_v9 }
  0x97   : > { %v733_v11 = vpop.eup %732 }
  0x98   : > { %285 = vrot.lane.b32.xlu0 %v733_v11, %s792_s14 }
 0x10a   : > { %v286_v14 = vpop.permute.xlu0 %285 }
 0x10b   : > { %v288_v15 = vmul.f32 %v286_v14, %v281_v13 }
 0x10d   : > { %v289_v16 = vmul.f32 %v288_v15, %v274_v5 }
 0x10f   : > { %291 = vrot.lane.b32.xlu1 %v289_v16, %s790_s13 }
 0x113   : > { %299 = vperm.xlu1 %728, %v288_v15  }
 0x181   : > { %v292_v17 = vpop.permute.xlu1 %291 }
 0x182   : > { %v294_v18 = vsub.f32 %v281_v13, %v292_v17 }
 0x184   : > { %305 = vperm.xlu0 %729, %v294_v18  }
 0x192   : > { %v300_v22 = vpop.permute.xlu1 %299 }
 0x193   : > { %v302_v23 = vmul.f32 %v300_v22, %v296_v21 }
 0x203   : > { %v306_v24 = vpop.permute.xlu0 %305 }
 0x204   : > { %v308_v25 = vadd.f32 %v306_v24, %v302_v23 }
 0x206   : > { %v309_v26 = vmax.f32 %v308_v25, 0.0 }
 0x208   : > { %v314_v27 = vpack.c.bf16 %v309_v26, %v309_v26 }
 0x20a   : > { %667 = vmatprep.subr.msk.bf16.mxu0 %vm332_vm2, %v314_v27  ;;  %v334_v28 = vsel %vm332_vm2, %v314_v27, 0 }
 0x20b   : > { %662 = vmatpush3.bf16.msra.mxu0 %v334_v28 }
 0x20e   : > { %664 = vmatmul.mubr.msk.bf16.vlgmr.msra.gmra.mrb[0].mxu0 %vm325_vm1, %v731_v29 }
 0x2e1   : > { %v665_v30 = vpop.f32.mrb[0].mxu0 }
 0x2e2   : > { %409 = vadd.xlane.f32.xlu1 %v665_v30  ;;  %v370_v31 = vpop.f32.mrb[1].mxu0  ;;  %v415_v38 = vmul.f32 %v665_v30, %v665_v30 }
 0x2e3   : > { %v666_v32 = vpop.f32.mrb[2].mxu0  ;;  %v413_v36 = vmul.f32 %v370_v31, %v370_v31 }
 0x2e4   : > { %v655_v33 = vpack.c.bf16 %v666_v32, %v665_v30  ;;  %411 = vadd.xlane.f32.xlu0 %v666_v32  ;;  %v373_v34 = vpop.f32.mrb[3].mxu0  ;;  %v416_v39 = vmul.f32 %v666_v32, %v666_v32 }
 0x2e5   : > { %v650_v35 = vpack.c.bf16 %v373_v34, %v370_v31  ;;  %v414_v37 = vmul.f32 %v373_v34, %v373_v34 }
 0x2e6   : > { %657 = vst [vmem:[%s916_s17 + $0x8] sm:$0xff] %v655_v33   ;;  %405 = vadd.xlane.f32.xlu1 %v370_v31 }
 0x2e7   : > { %651 = vst [vmem:[%s916_s17] sm:$0xff] %v650_v35  }
 0x2e8   : > { %407 = vadd.xlane.f32.xlu0 %v373_v34 }
 0x2ea   : > { %417 = vadd.xlane.f32.xlu1 %v413_v36 }
 0x2ec   : > { %419 = vadd.xlane.f32.xlu0 %v414_v37 }
 0x2ed   : > { %v473_v54 = vld [vmem:[%s916_s17 + $0x8] sm:$0xf] (%p870_p5)  ;;  %v475_v55 = vld [vmem:[%s916_s17 + $0xc] sm:$0xf] (%p870_p5) }
 0x2ee   : > { %421 = vadd.xlane.f32.xlu1 %v415_v38  ;;  %v469_v52 = vld [vmem:[%s916_s17] sm:$0xf] (%p870_p5)  ;;  %v471_v53 = vld [vmem:[%s916_s17 + $0x4] sm:$0xf] (%p870_p5)  ;;  %474 = vst [vmem:[%s453_s15 + $0x10] sm:$0xf] (%p870_p5), %v473_v54 }
 0x2ef   : > { %470 = vst [vmem:[%s453_s15] sm:$0xf] (%p870_p5), %v469_v52  ;;  %472 = vst [vmem:[%s453_s15 + $0x8] sm:$0xf] (%p870_p5), %v471_v53 }
 0x2f0   : > { %423 = vadd.xlane.f32.xlu0 %v416_v39  ;;  %476 = vst [vmem:[%s453_s15 + $0x18] sm:$0xf] (%p870_p5), %v475_v55 }
 0x36f   : > { %v410_v40 = vpop.xlane.xlu1 %409 }
 0x371   : > { %v412_v41 = vpop.xlane.xlu0 %411 }
 0x373   : > { %v406_v42 = vpop.xlane.xlu1 %405 }
 0x375   : > { %v408_v43 = vpop.xlane.xlu0 %407 }
 0x377   : > { %v418_v44 = vpop.xlane.xlu1 %417 }
 0x378   : > { %v426_v45 = vsel %vm425_vm3, %v406_v42, %v418_v44 }
 0x379   : > { %430 = vst.msk [vmem:[%s266_s11] sm:$0xff] %vm270_vm0, %v426_v45  ;;  %v420_v46 = vpop.xlane.xlu0 %419  ;;  %449 = sbr.rel (!%p870_p5) target bundleno = 896 (0x380), region = 40 }
 0x37a   : > { %v427_v47 = vsel %vm425_vm3, %v408_v43, %v420_v46 }
 0x37b   : > { %431 = vst.msk [vmem:[%s266_s11 + $0x8] sm:$0xff] %vm270_vm0, %v427_v47  ;;  %v422_v48 = vpop.xlane.xlu1 %421 }
 0x37c   : > { %v428_v49 = vsel %vm425_vm3, %v410_v40, %v422_v48 }
 0x37d   : > { %432 = vst.msk [vmem:[%s266_s11 + $0x10] sm:$0xff] %vm270_vm0, %v428_v49  ;;  %v424_v50 = vpop.xlane.xlu0 %423 }
 0x37e   : > { %v429_v51 = vsel %vm425_vm3, %v412_v41, %v424_v50 }
 0x37f   : > { %433 = vst.msk [vmem:[%s266_s11 + $0x18] sm:$0xff] %vm270_vm0, %v429_v51 }
 0x380 PF: > { %s16_s24 = sadd.s32 1, %s788_s24   ;;  %s968_s18 = smov %s768_s19 }
 0x381   : > { %p13_p11 = scmp.ge.s32.totalorder %s16_s24, 6   ;;  %s969_s19 = smov %s881_s8 }
 0x382   : > { %s970_s20 = smov %s780_s22  ;;  %s971_s21 = smov %s784_s23 }
 0x383   : > { %s972_s22 = smov %s975_s25  ;;  %s973_s23 = smov %s979_s26 }
 0x384   :  { %15 = sbr.rel (!%p13_p11) target bundleno = 4 (0x4), region = 119 }

// kernel: bottleneck_forward.7
= control target key start
LH: loop header
LB: loop body
LE: loop exit
PB: predicated region body
PF: predicated region fallthrough
CT: control target
= control target key end

     0   :  { %s866_s15 = smov 0   ;;  %s868_s16 = smov 0   ;;  %s1060_s0 = inlined_call_operand.vmem [shape: bf16[2,32,256], index: 0, kind: input, shape index: {}]   ;;  %s1061_s1 = inlined_call_operand.vmem [shape: f32[2,2,32,2], index: 1, kind: input, shape index: {}]   ;;  %s1062_s2 = inlined_call_operand.vmem [shape: f32[32,2], index: 2, kind: input, shape index: {}]   ;;  %s1063_s3 = inlined_call_operand.vmem [shape: f32[2,32,256], index: 3, kind: input, shape index: {}]   ;;  %s1064_s4 = inlined_call_operand.vmem [shape: f32[2,32,256], index: 4, kind: output, shape index: {}]  }
   0x1   :  { %s870_s17 = smov 0   ;;  %s872_s18 = smov 0  }
   0x2   :  { %s874_s19 = smov 0   ;;  %s876_s20 = smov 0  }
   0x3   :  { %s878_s21 = smov 0  }
   0x4 LB: > { %s23_s22 = sadd.s32 1, %s827_s19  ;;  %s26_s23 = sadd.s32 1, %s831_s20  ;;  %s835_s21 = sphi %s878_s21, %s14_s21   ;;  %s831_s20 = sphi %s876_s20, %s1072_s20   ;;  %s827_s19 = sphi %s874_s19, %s1071_s19   ;;  %s823_s18 = sphi %s872_s18, %s1070_s18   ;;  %s819_s17 = sphi %s870_s17, %s1069_s17   ;;  %s815_s16 = sphi %s868_s16, %s1068_s16   ;;  %s811_s15 = sphi %s866_s15, %s1067_s15  }
   0x5   : > { %p24_p0 = scmp.ge.s32.totalorder %s23_s22, 2  ;;  %s681_s24 = sadd.s32 4294967295, %s835_s21  }
   0x6   : > { %p42_p1 = scmp.ne.s32.totalorder %s815_s16, %s811_s15  ;;  %p43_p2 = scmp.eq.s32.totalorder %s835_s21, 0 }
   0x7   : > { %s1074_s22 = smov (%p24_p0, %s23_s22), 0  ;;  %s1076_s23 = smov (!%p24_p0, %s26_s23), %s831_s20 }
   0x8   : > { %p28_p3 = scmp.ge.s32.totalorder %s1076_s23, 2  ;;  %p144_p4 = scmp.eq.s32.totalorder %s681_s24, 3 }
   0x9   : > { %s31_s25 = ssub.s32 %s827_s19, %s1074_s22  ;;  %p912_p5 = por %p43_p2, %p42_p1 }
   0xa   : > { %s1078_s23 = smov (%p28_p3, %s1076_s23), 0  ;;  %p918_p6 = por %p144_p4, %p42_p1 }
   0xb   : > { %s30_s28 = ssub.s32 %s831_s20, %s1078_s23  ;;  %s35_s30 = sadd.s32 1, %s815_s16 }
   0xc   : > { %s32_s29 = sor.u32 %s31_s25, %s30_s28  ;;  %p684_p8 = scmp.ge.s32.totalorder %s835_s21, 4 }
   0xd   : > { %p33_p7 = scmp.eq.s32.totalorder %s32_s29, 0 }
   0xe   : > { %172 = sbr.rel (%p684_p8) target bundleno = 37 (0x25), region = 24 }
   0xf   : > { %s926_s5 = scalar_select %p33_p7, %s815_s16, %s35_s30  }
  0x15   : > { %175 = sbr.rel (!%p912_p5) target bundleno = 29 (0x1d), region = 28  ;;  %s177_s6 = sand.u32 (%p912_p5), 1, %s815_s16  }
  0x16   : > { %s686_s7 = sshll.u32 (%p912_p5), %s831_s20, 3  ;;  %s685_s8 = sshll.u32 (%p912_p5), %s177_s6, 4 }
  0x17   : > { %s181_s9 = sadd.s32 (%p912_p5), %s827_s19, %s686_s7  ;;  %s179_s14 = scalar_lea.vmem (%p912_p5), [#allocation2], %s685_s8 }
  0x18   : > { %s687_s10 = sshll.u32 (%p912_p5), %s181_s9, 2 }
  0x19   : > { %s183_s13 = scalar_lea.vmem (%p912_p5), %s1060_s0, %s687_s10 }
  0x1a   : > { %v199_v0 = vld [vmem:[%s183_s13] sm:$0xf] (%p912_p5)  ;;  %v201_v1 = vld [vmem:[%s183_s13 + $0x8] sm:$0xf] (%p912_p5)  ;;  %v203_v2 = vld [vmem:[%s183_s13 + $0x10] sm:$0xf] (%p912_p5) }
  0x1b   : > { %200 = vst [vmem:[%s179_s14] sm:$0xf] (%p912_p5), %v199_v0  ;;  %202 = vst [vmem:[%s179_s14 + $0x4] sm:$0xf] (%p912_p5), %v201_v1  ;;  %v205_v3 = vld [vmem:[%s183_s13 + $0x18] sm:$0xf] (%p912_p5) }
  0x1c   : > { %204 = vst [vmem:[%s179_s14 + $0x8] sm:$0xf] %v203_v2  ;;  %206 = vst [vmem:[%s179_s14 + $0xc] sm:$0xf] %v205_v3 }
  0x1d PF: > { %237 = sbr.rel (!%p912_p5) target bundleno = 37 (0x25), region = 69  ;;  %s239_s24 = sand.u32 (%p912_p5), 1, %s815_s16  }
  0x1e   : > { %s689_s25 = sshll.u32 (%p912_p5), %s831_s20, 3  ;;  %s688_s28 = sshll.u32 (%p912_p5), %s239_s24, 5 }
  0x1f   : > { %s243_s29 = sadd.s32 (%p912_p5), %s827_s19, %s689_s25  ;;  %s241_s9 = scalar_lea.vmem (%p912_p5), [#allocation3], %s688_s28 }
  0x20   : > { %s690_s30 = sshll.u32 (%p912_p5), %s243_s29, 3 }
  0x21   : > { %s245_s8 = scalar_lea.vmem (%p912_p5), %s1063_s3, %s690_s30 }
  0x22   : > { %v279_v4 = vld [vmem:[%s245_s8] sm:$0xff] (%p912_p5)  ;;  %v281_v5 = vld [vmem:[%s245_s8 + $0x10] sm:$0xff] (%p912_p5) }
  0x23   : > { %v283_v6 = vld [vmem:[%s245_s8 + $0x20] sm:$0xff] (%p912_p5)  ;;  %280 = vst [vmem:[%s241_s9] sm:$0xff] (%p912_p5), %v279_v4  ;;  %282 = vst [vmem:[%s241_s9 + $0x8] sm:$0xff] (%p912_p5), %v281_v5  ;;  %v285_v7 = vld [vmem:[%s245_s8 + $0x30] sm:$0xff] (%p912_p5) }
  0x24   : > { %284 = vst [vmem:[%s241_s9 + $0x10] sm:$0xff] %v283_v6  ;;  %286 = vst [vmem:[%s241_s9 + $0x18] sm:$0xff] %v285_v7 }
  0x25 PF: > { %p691_p9 = scmp.ge.s32.totalorder %s835_s21, 1  ;;  %p291_p10 = scmp.lt.s32.totalorder %s835_s21, 5 }
  0x27   : > { %p292_p11 = pnand %p691_p9, %p291_p10 }
  0x28   : > { %v333_v8 = vld [vmem:[%s1061_s1] sm:$0xff] (!%p292_p11)  ;;  %vm349_vm0 = vcmask (!%p292_p11), 15360   ;;  %v335_v15 = vld [vmem:[%s1061_s1 + $0x10] sm:$0xff] (!%p292_p11)  ;;  %v334_v22 = vld [vmem:[%s1061_s1 + $0x8] sm:$0xff] (!%p292_p11)  ;;  %s837_s11 = smov (!%p292_p11), 1   ;;  %s839_s12 = smov (!%p292_p11), 127  }
  0x29   : > { %295 = sbr.rel (%p292_p11) target bundleno = 570 (0x23a), region = 107  ;;  %v337_v9 = vld [vmem:[%s1061_s1 + $0x20] sm:$0xff] (!%p292_p11)  ;;  %v350_v12 = vsel (!%p292_p11), %vm349_vm0, %v333_v8, 0.0  ;;  %v339_v16 = vld [vmem:[%s1061_s1 + $0x30] sm:$0xff] (!%p292_p11)  ;;  %v364_v20 = vsel (!%p292_p11), %vm349_vm0, %v335_v15, 0.0  ;;  %v338_v26 = vld [vmem:[%s1061_s1 + $0x28] sm:$0xff] (!%p292_p11) }
  0x2a   : > { %v341_v10 = vld [vmem:[%s1061_s1 + $0x40] sm:$0xff] (!%p292_p11)  ;;  %v351_v13 = vsel (!%p292_p11), %vm349_vm0, %v337_v9, 0.0  ;;  %v343_v18 = vld [vmem:[%s1061_s1 + $0x50] sm:$0xff] (!%p292_p11)  ;;  %v365_v21 = vsel (!%p292_p11), %vm349_vm0, %v339_v16, 0.0  ;;  %v342_v27 = vld [vmem:[%s1061_s1 + $0x48] sm:$0xff] (!%p292_p11)  ;;  %v357_v29 = vsel (!%p292_p11), %vm349_vm0, %v334_v22, 0.0 }
  0x2b   : > { %v345_v11 = vld [vmem:[%s1061_s1 + $0x60] sm:$0xff] (!%p292_p11)  ;;  %v353_v14 = vsel (!%p292_p11), %vm349_vm0, %v341_v10, 0.0  ;;  %v352_v17 = vadd.f32 (!%p292_p11), %v351_v13, %v350_v12  ;;  %v347_v19 = vld [vmem:[%s1061_s1 + $0x70] sm:$0xff] (!%p292_p11)  ;;  %v366_v24 = vadd.f32 (!%p292_p11), %v365_v21, %v364_v20  ;;  %v367_v25 = vsel (!%p292_p11), %vm349_vm0, %v343_v18, 0.0  ;;  %v346_v28 = vld [vmem:[%s1061_s1 + $0x68] sm:$0xff] (!%p292_p11)  ;;  %s298_s7 = sand.u32 (!%p292_p11), 1, %s811_s15  }
  0x2c   : > { %v355_v23 = vsel (!%p292_p11), %vm349_vm0, %v345_v11, 0.0  ;;  %v369_v31 = vsel (!%p292_p11), %vm349_vm0, %v347_v19, 0.0  ;;  %v358_v32 = vsel (!%p292_p11), %vm349_vm0, %v338_v26, 0.0  ;;  %v360_v33 = vsel (!%p292_p11), %vm349_vm0, %v342_v27, 0.0  ;;  %v336_v34 = vld [vmem:[%s1061_s1 + $0x18] sm:$0xff] (!%p292_p11)  ;;  %v406_v13 = vld [vmem:[%s1062_s2] sm:$0xff] (!%p292_p11) }
  0x2d   : > { %v354_v30 = vadd.f32 (!%p292_p11), %v353_v14, %v352_v17  ;;  %v340_v35 = vld [vmem:[%s1061_s1 + $0x38] sm:$0xff] (!%p292_p11)  ;;  %v368_v37 = vadd.f32 (!%p292_p11), %v367_v25, %v366_v24  ;;  %v359_v38 = vadd.f32 (!%p292_p11), %v358_v32, %v357_v29  ;;  %v371_v40 = vsel (!%p292_p11), %vm349_vm0, %v336_v34, 0.0  ;;  %v407_v16 = vld [vmem:[%s1062_s2 + $0x8] sm:$0xff] (!%p292_p11)  ;;  %v408_v17 = vld [vmem:[%s1062_s2 + $0x10] sm:$0xff] (!%p292_p11)  ;;  %s692_s8 = sshll.u32 (!%p292_p11), %s298_s7, 4  ;;  %s693_s26 = sshll.u32 (!%p292_p11), %s298_s7, 5 }
  0x2e   : > { %v344_v36 = vld [vmem:[%s1061_s1 + $0x58] sm:$0xff] (!%p292_p11)  ;;  %v372_v41 = vsel (!%p292_p11), %vm349_vm0, %v340_v35, 0.0  ;;  %v362_v43 = vsel (!%p292_p11), %vm349_vm0, %v346_v28, 0.0  ;;  %v838_v8 = vmov (!%p292_p11), 0   ;;  %v840_v29 = vmov (!%p292_p11), 1   ;;  %s300_s9 = scalar_lea.vmem (!%p292_p11), [#allocation2], %s692_s8 }
  0x2f   : > { %v348_v39 = vld [vmem:[%s1061_s1 + $0x78] sm:$0xff] (!%p292_p11)  ;;  %v356_v42 = vadd.f32 (!%p292_p11), %v355_v23, %v354_v30  ;;  %v373_v44 = vadd.f32 (!%p292_p11), %v372_v41, %v371_v40  ;;  %v374_v45 = vsel (!%p292_p11), %vm349_vm0, %v344_v36, 0.0  ;;  %v370_v46 = vadd.f32 (!%p292_p11), %v369_v31, %v368_v37  ;;  %769 = vset.pattern.permute.xlu0 (!%p292_p11), %v838_v8  ;;  %770 = vset.pattern.permute.xlu1 (!%p292_p11), %v838_v8  ;;  %s307_s10 = scalar_lea.vmem (!%p292_p11), [#allocation3], %s693_s26  ;;  %s332_s15 = scalar_lea.vmem (!%p292_p11), [#allocation4], %s693_s26 }
  0x30   : > { %v361_v47 = vadd.f32 %v360_v33, %v359_v38  ;;  %v376_v48 = vsel %vm349_vm0, %v348_v39, 0.0  ;;  %v409_v23 = vld [vmem:[%s1062_s2 + $0x18] sm:$0xff]  ;;  %v701_v39 = vld [vmem:[%s300_s9] sm:$0xff]  }
  0x31   : > { %v378_v49 = vmul.f32 0.001953125, %v356_v42  ;;  %v375_v50 = vadd.f32 %v374_v45, %v373_v44  ;;  %v380_v51 = vmul.f32 0.001953125, %v370_v46  ;;  %v702_v41 = vunpack.c.l.bf16 %v701_v39 }
  0x32   : > { %v363_v52 = vadd.f32 %v362_v43, %v361_v47  ;;  %v708_v43 = vld [vmem:[%s300_s9 + $0x8] sm:$0xff]   ;;  %v703_v45 = vunpack.c.h.bf16 %v701_v39 }
  0x33   : > { %v382_v53 = vmul.f32 %v378_v49, %v378_v49  ;;  %v377_v54 = vadd.f32 %v376_v48, %v375_v50  ;;  %v384_v55 = vmul.f32 %v380_v51, %v380_v51  ;;  %v706_v46 = vunpack.c.l.bf16 %v708_v43 }
  0x34   : > { %v379_v56 = vmul.f32 0.001953125, %v363_v52  ;;  %v707_v52 = vunpack.c.h.bf16 %v708_v43 }
  0x35   : > { %390 = vrot.lane.b32.xlu0 %v382_v53, %s837_s11  ;;  %v381_v57 = vmul.f32 0.001953125, %v377_v54  ;;  %394 = vrot.lane.b32.xlu1 %v384_v55, %s837_s11 }
  0x36   : > { %v383_v58 = vmul.f32 %v379_v56, %v379_v56 }
  0x37   : > { %v385_v59 = vmul.f32 %v381_v57, %v381_v57 }
  0x39   : > { %392 = vrot.lane.b32.xlu0 %v383_v58, %s837_s11  ;;  %396 = vrot.lane.b32.xlu1 %v385_v59, %s837_s11  ;;  %v519_v58 = vld [vmem:[%s307_s10 + $0x8] sm:$0xff] }
  0xa7   : > { %v391_v60 = vpop.permute.xlu0 %390  ;;  %v395_v62 = vpop.permute.xlu1 %394 }
  0xa8   : > { %v402_v61 = vsub.f32 %v378_v49, %v391_v60  ;;  %v404_v63 = vsub.f32 %v380_v51, %v395_v62 }
  0xaa   : > { %v410_v0 = vadd.f32 1e-05, %v402_v61  ;;  %v412_v1 = vadd.f32 1e-05, %v404_v63 }
  0xab   : > { %v393_v2 = vpop.permute.xlu0 %392  ;;  %v397_v4 = vpop.permute.xlu1 %396 }
  0xac   : > { %773 = vrsqrt.f32 %v410_v0  ;;  %v403_v3 = vsub.f32 %v379_v56, %v393_v2  ;;  %v405_v5 = vsub.f32 %v381_v57, %v397_v4  ;;  %v521_v2 = vld [vmem:[%s307_s10 + $0x18] sm:$0xff] }
  0xad   : > { %775 = vrsqrt.f32 %v412_v1 }
  0xae   : > { %v411_v6 = vadd.f32 1e-05, %v403_v3  ;;  %v413_v7 = vadd.f32 1e-05, %v405_v5 }
  0xb0   : > { %777 = vrsqrt.f32 %v411_v6 }
  0xb1   : > { %779 = vrsqrt.f32 %v413_v7 }
  0xb6   : > { %v774_v9 = vpop.eup %773 }
  0xb7   : > { %422 = vrot.lane.b32.xlu0 %v774_v9, %s839_s12  ;;  %v776_v10 = vpop.eup %775 }
  0xba   : > { %v778_v11 = vpop.eup %777 }
  0xbb   : > { %426 = vrot.lane.b32.xlu0 %v776_v10, %s839_s12  ;;  %424 = vrot.lane.b32.xlu1 %v778_v11, %s839_s12  ;;  %v780_v12 = vpop.eup %779 }
  0xbf   : > { %428 = vrot.lane.b32.xlu1 %v780_v12, %s839_s12 }
 0x129   : > { %v423_v14 = vpop.permute.xlu0 %422 }
 0x12a   : > { %v434_v15 = vmul.f32 %v423_v14, %v406_v13 }
 0x12c   : > { %v438_v18 = vmul.f32 %v434_v15, %v378_v49  ;;  %v518_v49 = vld [vmem:[%s307_s10] sm:$0xff] }
 0x12d   : > { %v425_v19 = vpop.permute.xlu1 %424  ;;  %v427_v20 = vpop.permute.xlu0 %426 }
 0x12e   : > { %v435_v21 = vmul.f32 %v425_v19, %v407_v16  ;;  %v436_v22 = vmul.f32 %v427_v20, %v408_v17  ;;  %446 = vrot.lane.b32.xlu0 %v438_v18, %s837_s11 }
 0x130   : > { %v439_v24 = vmul.f32 %v435_v21, %v379_v56  ;;  %v440_v25 = vmul.f32 %v436_v22, %v380_v51  ;;  %v520_v56 = vld [vmem:[%s307_s10 + $0x10] sm:$0xff] }
 0x131   : > { %v429_v26 = vpop.permute.xlu1 %428 }
 0x132   : > { %v437_v27 = vmul.f32 %v429_v26, %v409_v23  ;;  %448 = vrot.lane.b32.xlu1 %v439_v24, %s837_s11  ;;  %450 = vrot.lane.b32.xlu0 %v440_v25, %s837_s11 }
 0x134   : > { %v441_v28 = vmul.f32 %v437_v27, %v381_v57 }
 0x136   : > { %452 = vrot.lane.b32.xlu1 %v441_v28, %s837_s11  ;;  %472 = vperm.xlu0 %769, %v434_v15   ;;  %s696_s11 = sshll.u32 (%p918_p6), %s823_s18, 3 }
 0x137   : > { %s542_s12 = sadd.s32 (%p918_p6), %s819_s17, %s696_s11 }
 0x138   : > { %s697_s13 = sshll.u32 (%p918_p6), %s542_s12, 3 }
 0x139   : > { %s544_s25 = scalar_lea.vmem (%p918_p6), %s1064_s4, %s697_s13 }
 0x13a   : > { %477 = vperm.xlu1 %770, %v435_v21   ;;  %487 = vperm.xlu0 %769, %v437_v27  }
 0x13e   : > { %482 = vperm.xlu1 %770, %v436_v22   ;;  %772 = vset.pattern.permute.xlu0 %v840_v29 }
 0x142   : > { %771 = vset.pattern.permute.xlu1 %v840_v29 }
 0x1a0   : > { %v447_v30 = vpop.permute.xlu0 %446 }
 0x1a1   : > { %v458_v31 = vsub.f32 %v406_v13, %v447_v30 }
 0x1a3   : > { %496 = vperm.xlu1 %771, %v458_v31  }
 0x1a4   : > { %v449_v32 = vpop.permute.xlu1 %448  ;;  %v451_v33 = vpop.permute.xlu0 %450 }
 0x1a5   : > { %v459_v34 = vsub.f32 %v407_v16, %v449_v32  ;;  %v460_v35 = vsub.f32 %v408_v17, %v451_v33 }
 0x1a7   : > { %501 = vperm.xlu0 %772, %v459_v34   ;;  %506 = vperm.xlu1 %771, %v460_v35  }
 0x1a8   : > { %v453_v36 = vpop.permute.xlu1 %452 }
 0x1a9   : > { %v461_v37 = vsub.f32 %v409_v23, %v453_v36 }
 0x1ab   : > { %511 = vperm.xlu1 %771, %v461_v37  }
 0x1b5   : > { %v473_v40 = vpop.permute.xlu0 %472 }
 0x1b6   : > { %v490_v44 = vmul.f32 %v702_v41, %v473_v40 }
 0x1b9   : > { %v478_v38 = vpop.permute.xlu1 %477  ;;  %v488_v47 = vpop.permute.xlu0 %487 }
 0x1ba   : > { %v491_v51 = vmul.f32 %v703_v45, %v478_v38  ;;  %v493_v62 = vmul.f32 %v707_v52, %v488_v47 }
 0x1bd   : > { %v483_v42 = vpop.permute.xlu1 %482 }
 0x1be   : > { %v492_v53 = vmul.f32 %v706_v46, %v483_v42 }
 0x222   : > { %v497_v48 = vpop.permute.xlu1 %496 }
 0x223   : > { %v514_v50 = vadd.f32 %v497_v48, %v490_v44 }
 0x225   : > { %v522_v54 = vadd.f32 %v518_v49, %v514_v50 }
 0x226   : > { %v507_v55 = vpop.permute.xlu1 %506  ;;  %v502_v57 = vpop.permute.xlu0 %501 }
 0x227   : > { %v526_v59 = vmax.f32 %v522_v54, 0.0  ;;  %v516_v60 = vadd.f32 %v507_v55, %v492_v53  ;;  %v515_v61 = vadd.f32 %v502_v57, %v491_v51 }
 0x229   : > { %530 = vst [vmem:[%s332_s15] sm:$0xff] %v526_v59  ;;  %v524_v63 = vadd.f32 %v520_v56, %v516_v60  ;;  %v523_v0 = vadd.f32 %v519_v58, %v515_v61 }
 0x22a   : > { %v512_v1 = vpop.permute.xlu1 %511 }
 0x22b   : > { %v528_v3 = vmax.f32 %v524_v63, 0.0  ;;  %v527_v4 = vmax.f32 %v523_v0, 0.0  ;;  %v517_v5 = vadd.f32 %v512_v1, %v493_v62  ;;  %540 = sbr.rel (!%p918_p6) target bundleno = 570 (0x23a), region = 119 }
 0x22d   : > { %532 = vst [vmem:[%s332_s15 + $0x10] sm:$0xff] %v528_v3  ;;  %531 = vst [vmem:[%s332_s15 + $0x8] sm:$0xff] %v527_v4  ;;  %v525_v6 = vadd.f32 %v521_v2, %v517_v5 }
 0x22f   : > { %v529_v7 = vmax.f32 %v525_v6, 0.0 }
 0x230   : > { %v578_v8 = vld [vmem:[%s332_s15] sm:$0xff] (%p918_p6) }
 0x231   : > { %533 = vst [vmem:[%s332_s15 + $0x18] sm:$0xff] %v529_v7  ;;  %579 = vst [vmem:[%s544_s25] sm:$0xff] (%p918_p6), %v578_v8 }
 0x234   : > { %v580_v9 = vld [vmem:[%s332_s15 + $0x8] sm:$0xff]  ;;  %v582_v10 = vld [vmem:[%s332_s15 + $0x10] sm:$0xff] }
 0x235   : > { %581 = vst [vmem:[%s544_s25 + $0x10] sm:$0xff] %v580_v9  ;;  %583 = vst [vmem:[%s544_s25 + $0x20] sm:$0xff] %v582_v10 }
 0x238   : > { %v584_v11 = vld [vmem:[%s332_s15 + $0x18] sm:$0xff] }
 0x239   : > { %585 = vst [vmem:[%s544_s25 + $0x30] sm:$0xff] %v584_v11 }
 0x23a PF: > { %s14_s21 = sadd.s32 1, %s835_s21   ;;  %s1067_s15 = smov %s815_s16 }
 0x23b   : > { %p11_p12 = scmp.ge.s32.totalorder %s14_s21, 6   ;;  %s1068_s16 = smov %s926_s5 }
 0x23c   : > { %s1069_s17 = smov %s827_s19  ;;  %s1070_s18 = smov %s831_s20 }
 0x23d   : > { %s1071_s19 = smov %s1074_s22  ;;  %s1072_s20 = smov %s1078_s23 }
 0x23e   :  { %13 = sbr.rel (!%p11_p12) target bundleno = 4 (0x4), region = 196 }

// kernel: bottleneck_forward.5
= control target key start
LH: loop header
LB: loop body
LE: loop exit
PB: predicated region body
PF: predicated region fallthrough
CT: control target
= control target key end

     0   :  { %s1270_s21 = smov 0   ;;  %s1461_s0 = inlined_call_operand.vmem [shape: bf16[2,8,256], index: 0, kind: input, shape index: {}]   ;;  %s1462_s1 = inlined_call_operand.vmem [shape: f32[2,2,8,2], index: 1, kind: input, shape index: {}]   ;;  %s1463_s2 = inlined_call_operand.vmem [shape: f32[8,2], index: 2, kind: input, shape index: {}]   ;;  %s1464_s3 = inlined_call_operand.vmem [shape: bf16[9,8,8], index: 3, kind: input, shape index: {}]   ;;  %s1465_s4 = inlined_call_operand.vmem [shape: f32[9,1,256], index: 4, kind: input, shape index: {}]   ;;  %s1466_s5 = inlined_call_operand.vmem [shape: bf16[2,8,256], index: 5, kind: output, shape index: {0}]   ;;  %s1467_s6 = inlined_call_operand.vmem [shape: f32[2,1,8,2], index: 6, kind: output, shape index: {1}]  }
   0x1 LB: > { %s1115_s22 = sadd.s32 4294967295, %s1223_s21   ;;  %p1119_p0 = scmp.ge.s32.totalorder %s1223_s21, 1  ;;  %s1223_s21 = sphi %s1270_s21, %s17_s21  }
   0x2   : > { %p215_p1 = scmp.lt.s32.totalorder %s1223_s21, 3 }
   0x4   : > { %p216_p2 = pnand %p1119_p0, %p215_p1 }
   0x5   : > { %v264_v0 = vld [vmem:[%s1462_s1] sm:$0xff] (!%p216_p2)  ;;  %v265_v1 = vld [vmem:[%s1462_s1 + $0x8] sm:$0xff] (!%p216_p2)  ;;  %v266_v2 = vld [vmem:[%s1462_s1 + $0x10] sm:$0xff] (!%p216_p2)  ;;  %vm268_vm0 = vcmask (!%p216_p2), 15360   ;;  %s1225_s7 = smov (!%p216_p2), 1   ;;  %v1226_v16 = vmov (!%p216_p2), 0   ;;  %v320_v25 = vlaneseq (!%p216_p2) }
   0x6   : > { %219 = sbr.rel (%p216_p2) target bundleno = 1047 (0x417), region = 40  ;;  %v267_v3 = vld [vmem:[%s1462_s1 + $0x18] sm:$0xff] (!%p216_p2)  ;;  %v269_v4 = vsel (!%p216_p2), %vm268_vm0, %v264_v0, 0.0  ;;  %v270_v5 = vsel (!%p216_p2), %vm268_vm0, %v265_v1, 0.0  ;;  %v272_v6 = vsel (!%p216_p2), %vm268_vm0, %v266_v2, 0.0  ;;  %1213 = vset.pattern.permute.xlu1 (!%p216_p2), %v1226_v16  ;;  %686 = vmatprep.mubr.bf16.mxu0 (!%p216_p2), %v1226_v16  ;;  %s1227_s8 = smov (!%p216_p2), 127  }
   0x7   : > { %v271_v7 = vadd.f32 (!%p216_p2), %v270_v5, %v269_v4  ;;  %v274_v8 = vsel (!%p216_p2), %vm268_vm0, %v267_v3, 0.0  ;;  %411 = vmatprep.mubr.bf16.mxu1 (!%p216_p2), %v1226_v16  ;;  %v1228_v18 = vmov (!%p216_p2), 1   ;;  %v283_v19 = vld [vmem:[%s1463_s2] sm:$0xff] (!%p216_p2)  ;;  %p249_p3 = scmp.lt.s32.totalorder (!%p216_p2), %s1115_s22, 1  ;;  %v328_v27 = vshrl.u32 (!%p216_p2), %v320_v25, 7  ;;  %s1229_s17 = smov (!%p216_p2), 16  }
   0x8   : > { %1214 = vset.pattern.permute.xlu0 (!%p216_p2), %v1228_v18  ;;  %v1139_v33 = vld [vmem:[%s1465_s4 + $0x8] sm:$0x3] (!%p216_p2)  ;;  %vm372_vm1 = vcmask (!%p216_p2), 1043456   ;;  %s1230_s18 = smov (!%p216_p2), 17   ;;  %vm368_vm2 = vcmask (!%p216_p2), 64512   ;;  %s1232_s23 = smov (!%p216_p2), 15  }
   0x9   : > { %v273_v9 = vadd.f32 (!%p216_p2), %v272_v6, %v271_v7  ;;  %v1313_v31 = vsub.s32 (!%p216_p2), 1, %v328_v27  ;;  %v1315_v32 = vsub.s32 (!%p216_p2), 0, %v328_v27  ;;  %v1140_v48 = vld [vmem:[%s1464_s3 + $0x10] sm:$0xf] (!%p216_p2)  ;;  %s1233_s24 = smov (!%p216_p2), 112   ;;  %s1234_s25 = smov (!%p216_p2), 111  }
   0xa   : > { %v1333_v49 = vand.u32 (!%p216_p2), 127, %v320_v25  ;;  %v1125_v52 = vld [vmem:[%s1465_s4 + $0x2] sm:$0x3] (!%p216_p2)  ;;  %v1143_v56 = vld [vmem:[%s1465_s4 + $0xa] sm:$0x3] (!%p216_p2)  ;;  %vm1026_vm11 = vcmask (!%p216_p2), 7168  }
   0xb   : > { %v275_v10 = vadd.f32 (!%p216_p2), %v274_v8, %v273_v9  ;;  %v636_v39 = vrot.slane (!%p216_p2), %v1139_v33, %v1313_v31  ;;  %v632_v40 = vrot.slane (!%p216_p2), %v1139_v33, %v1315_v32  ;;  %v355_v53 = vrot.slane (!%p216_p2), %v1125_v52, %v1315_v32  ;;  %v325_v0 = vld [vmem:[%s1465_s4] sm:$0x3] (!%p216_p2)  ;;  %v1144_v27 = vld [vmem:[%s1464_s3 + $0x14] sm:$0xf] (!%p216_p2) }
   0xc   : > { %vm346_vm3 = vcmp.lt.s32.totalorder (!%p216_p2), %v1333_v49, 16  ;;  %v359_v54 = vrot.slane (!%p216_p2), %v1125_v52, %v1313_v31  ;;  %vm701_vm4 = vcmp.lt.s32.totalorder (!%p216_p2), %v1333_v49, 127  ;;  %v710_v61 = vrot.slane (!%p216_p2), %v1143_v56, %v1315_v32 }
   0xd   : > { %v276_v11 = vmul.f32 0.001953125, %v275_v10  ;;  %s1469_s22 = smov (!%p249_p3, %s1115_s22), 1  ;;  %v714_v62 = vrot.slane %v1143_v56, %v1313_v31  ;;  %vm322_vm5 = vcmp.lt.s32.totalorder %v1333_v49, 17  ;;  %v330_v7 = vrot.slane %v325_v0, %v1315_v32 }
   0xe   : > { %s1307_s11 = sshll.u32 %s1469_s22, 3  ;;  %s1231_s22 = smov 113   ;;  %vm779_vm6 = vcmp.lt.s32.totalorder %v1333_v49, 113  ;;  %vm474_vm7 = vcmp.lt.s32.totalorder %v1333_v49, 15  ;;  %vm857_vm8 = vcmp.lt.s32.totalorder %v1333_v49, 112  ;;  %vm552_vm9 = vcmp.lt.s32.totalorder %v1333_v49, 1 }
   0xf   : > { %v277_v12 = vmul.f32 %v276_v11, %v276_v11  ;;  %s253_s14 = scalar_lea.vmem %s1461_s0, %s1307_s11  ;;  %vm935_vm10 = vcmp.lt.s32.totalorder %v1333_v49, 111  ;;  %s258_s15 = scalar_lea.vmem %s1466_s5, %s1307_s11 }
  0x10   : > { %v297_v26 = vld [vmem:[%s253_s14] sm:$0xff] }
  0x11   : > { %279 = vrot.lane.b32.xlu0 %v277_v12, %s1225_s7  ;;  %v298_v28 = vunpack.c.l.bf16 %v297_v26  ;;  %v299_v29 = vunpack.c.h.bf16 %v297_v26  ;;  %v1147_v12 = vld [vmem:[%s1465_s4 + $0xc] sm:$0x3]  ;;  %v1131_v26 = vld [vmem:[%s1465_s4 + $0x4] sm:$0x3] }
  0x12   : > { %v792_v25 = vrot.slane %v1147_v12, %v1313_v31 }
  0x83   : > { %v280_v13 = vpop.permute.xlu0 %279 }
  0x84   : > { %v282_v14 = vsub.f32 %v276_v11, %v280_v13  ;;  %v1126_v13 = vld [vmem:[%s1464_s3 + $0x4] sm:$0xf] }
  0x86   : > { %v284_v15 = vadd.f32 1e-05, %v282_v14 }
  0x88   : > { %1215 = vrsqrt.f32 %v284_v15 }
  0x92   : > { %v1216_v17 = vpop.eup %1215 }
  0x93   : > { %287 = vrot.lane.b32.xlu0 %v1216_v17, %s1227_s8 }
 0x105   : > { %v288_v20 = vpop.permute.xlu0 %287 }
 0x106   : > { %v290_v21 = vmul.f32 %v288_v20, %v283_v19  ;;  %v788_v20 = vrot.slane %v1147_v12, %v1315_v32 }
 0x108   : > { %v291_v22 = vmul.f32 %v290_v21, %v276_v11  ;;  %v334_v11 = vrot.slane %v325_v0, %v1313_v31 }
 0x10a   : > { %293 = vrot.lane.b32.xlu1 %v291_v22, %s1225_s7 }
 0x10e   : > { %302 = vperm.xlu1 %1213, %v290_v21  }
 0x17c   : > { %v294_v23 = vpop.permute.xlu1 %293 }
 0x17d   : > { %v296_v24 = vsub.f32 %v283_v19, %v294_v23 }
 0x17f   : > { %309 = vperm.xlu0 %1214, %v296_v24  }
 0x18d   : > { %v303_v30 = vpop.permute.xlu1 %302 }
 0x18e   : > { %v305_v34 = vmul.f32 %v303_v30, %v298_v28  ;;  %v306_v35 = vmul.f32 %v303_v30, %v299_v29 }
 0x1fe   : > { %v310_v36 = vpop.permute.xlu0 %309 }
 0x1ff   : > { %v312_v37 = vadd.f32 %v310_v36, %v305_v34  ;;  %v313_v38 = vadd.f32 %v310_v36, %v306_v35  ;;  %v483_v35 = vrot.slane %v1131_v26, %v1315_v32 }
 0x201   : > { %v314_v41 = vmax.f32 %v312_v37, 0.0  ;;  %v315_v42 = vmax.f32 %v313_v38, 0.0 }
 0x203   : > { %697 = vrot.lane.b32.xlu0 %v314_v41, %s1227_s8  ;;  %342 = vrot.lane.b32.xlu1 %v314_v41, %s1229_s17  ;;  %v640_v43 = vmul.f32 %v636_v39, %v315_v42  ;;  %v639_v44 = vmul.f32 %v632_v40, %v314_v41  ;;  %v487_v39 = vrot.slane %v1131_v26, %v1313_v31  ;;  %v1151_v40 = vld [vmem:[%s1465_s4 + $0xe] sm:$0x3] }
 0x204   : > { %v870_v52 = vrot.slane %v1151_v40, %v1313_v31  ;;  %v1136_v26 = vld [vmem:[%s1464_s3 + $0xc] sm:$0xf] }
 0x205   : > { %v642_v45 = vpack.c.bf16 %v640_v43, %v640_v43  ;;  %v641_v46 = vpack.c.bf16 %v639_v44, %v639_v44 }
 0x207   : > { %1141 = vmatprep.subr.msk.bf16.mxu0 %vm372_vm1, %v642_v45  ;;  %316 = vrot.lane.b32.xlu0 %v314_v41, %s1230_s18  ;;  %v649_v47 = vsel %vm372_vm1, %v641_v46, 0 }
 0x208   : > { %344 = vrot.lane.b32.xlu1 %v315_v42, %s1229_s17  ;;  %655 = vmatpush1.bf16.msra.mxu0 %v649_v47  ;;  %v866_v47 = vrot.slane %v1151_v40, %v1315_v32 }
 0x20b   : > { %775 = vrot.lane.b32.xlu0 %v314_v41, %s1231_s22  ;;  %1142 = vmatmul.mubr.msk.bf16.vlgmr.msra.gmra.mrb[0].mxu0 %vm368_vm2, %v1140_v48 }
 0x20c   : > { %699 = vrot.lane.b32.xlu1 %v315_v42, %s1227_s8  ;;  %764 = vmatprep.mubr.bf16.mxu0 %v1226_v16 }
 0x20f   : > { %470 = vrot.lane.b32.xlu0 %v314_v41, %s1232_s23 }
 0x210   : > { %318 = vrot.lane.b32.xlu1 %v315_v42, %s1230_s18  ;;  %s262_s18 = scalar_lea.vmem %s1467_s6, %s1307_s11 }
 0x213   : > { %853 = vrot.lane.b32.xlu0 %v314_v41, %s1233_s24 }
 0x214   : > { %777 = vrot.lane.b32.xlu1 %v315_v42, %s1231_s22 }
 0x217   : > { %548 = vrot.lane.b32.xlu0 %v314_v41, %s1225_s7 }
 0x218   : > { %472 = vrot.lane.b32.xlu1 %v315_v42, %s1232_s23 }
 0x21b   : > { %931 = vrot.lane.b32.xlu0 %v314_v41, %s1234_s25 }
 0x21c   : > { %855 = vrot.lane.b32.xlu1 %v315_v42, %s1233_s24 }
 0x220   : > { %550 = vrot.lane.b32.xlu1 %v315_v42, %s1225_s7 }
 0x224   : > { %933 = vrot.lane.b32.xlu1 %v315_v42, %s1234_s25 }
 0x275   : > { %v698_v50 = vpop.permute.xlu0 %697  ;;  %v343_v51 = vpop.permute.xlu1 %342 }
 0x279   : > { %v317_v55 = vpop.permute.xlu0 %316 }
 0x27a   : > { %v345_v57 = vpop.permute.xlu1 %344 }
 0x27b   : > { %v347_v58 = vsel %vm346_vm3, %v343_v51, %v345_v57  ;;  %v348_v59 = vsel %vm346_vm3, %v345_v57, %v343_v51 }
 0x27c   : > { %v362_v60 = vmul.f32 %v355_v53, %v348_v59  ;;  %v363_v63 = vmul.f32 %v359_v54, %v347_v58  ;;  %v1135_v53 = vld [vmem:[%s1465_s4 + $0x6] sm:$0x3]  ;;  %v341_v54 = vld [vmem:[%s1464_s3] sm:$0xf] }
 0x27d   : > { %v776_v1 = vpop.permute.xlu0 %775 }
 0x27e   : > { %v700_v2 = vpop.permute.xlu1 %699  ;;  %v365_v3 = vpack.c.bf16 %v363_v63, %v363_v63  ;;  %v364_v4 = vpack.c.bf16 %v362_v60, %v362_v60  ;;  %v561_v60 = vrot.slane %v1135_v53, %v1315_v32 }
 0x27f   : > { %v702_v5 = vsel %vm701_vm4, %v698_v50, %v700_v2  ;;  %v703_v6 = vsel %vm701_vm4, %v700_v2, %v698_v50  ;;  %v1155_v2 = vld [vmem:[%s1465_s4 + $0x10] sm:$0x3] }
 0x280   : > { %v717_v8 = vmul.f32 %v710_v61, %v702_v5  ;;  %v718_v9 = vmul.f32 %v714_v62, %v703_v6  ;;  %1127 = vmatprep.subr.msk.bf16.mxu1 %vm372_vm1, %v365_v3  ;;  %v374_v10 = vsel %vm372_vm1, %v364_v4, 0  ;;  %v1148_v3 = vld [vmem:[%s1464_s3 + $0x18] sm:$0xf] }
 0x281   : > { %380 = vmatpush1.bf16.msra.mxu1 %v374_v10  ;;  %v471_v21 = vpop.permute.xlu0 %470 }
 0x282   : > { %v719_v14 = vpack.c.bf16 %v717_v8, %v717_v8  ;;  %v720_v15 = vpack.c.bf16 %v718_v9, %v718_v9  ;;  %v319_v17 = vpop.permute.xlu1 %318  ;;  %v944_v9 = vrot.slane %v1155_v2, %v1315_v32 }
 0x283   : > { %v323_v18 = vsel %vm322_vm5, %v317_v55, %v319_v17  ;;  %v324_v19 = vsel %vm322_vm5, %v319_v17, %v317_v55 }
 0x284   : > { %v337_v22 = vmul.f32 %v330_v7, %v324_v19  ;;  %v338_v23 = vmul.f32 %v334_v11, %v323_v18  ;;  %1128 = vmatmul.mubr.msk.bf16.vlgmr.msra.gmra.mrb[0].mxu1 %vm368_vm2, %v1126_v13  ;;  %1145 = vmatprep.subr.msk.bf16.mxu0 %vm372_vm1, %v720_v15  ;;  %v727_v24 = vsel %vm372_vm1, %v719_v14, 0  ;;  %v948_v13 = vrot.slane %v1155_v2, %v1313_v31 }
 0x285   : > { %733 = vmatpush1.bf16.msra.mxu0 %v727_v24  ;;  %461 = vmatprep.mubr.bf16.mxu1 %v1226_v16  ;;  %v854_v41 = vpop.permute.xlu0 %853  ;;  %v1152_v24 = vld [vmem:[%s1464_s3 + $0x1c] sm:$0xf] }
 0x286   : > { %v339_v28 = vpack.c.bf16 %v337_v22, %v337_v22  ;;  %v340_v29 = vpack.c.bf16 %v338_v23, %v338_v23  ;;  %v778_v30 = vpop.permute.xlu1 %777 }
 0x287   : > { %v780_v33 = vsel %vm779_vm6, %v776_v1, %v778_v30  ;;  %v781_v34 = vsel %vm779_vm6, %v778_v30, %v776_v1  ;;  %v565_v1 = vrot.slane %v1135_v53, %v1313_v31 }
 0x288   : > { %v795_v36 = vmul.f32 %v788_v20, %v780_v33  ;;  %v796_v37 = vmul.f32 %v792_v25, %v781_v34  ;;  %1129 = vmatprep.subr.msk.bf16.mxu1 %vm372_vm1, %v340_v29  ;;  %1146 = vmatmul.mubr.msk.bf16.vlgmr.msra.gmra.mrb[0].mxu0 %vm368_vm2, %v1144_v27  ;;  %v424_v38 = vsel %vm372_vm1, %v339_v28, 0  ;;  %v1156_v27 = vld [vmem:[%s1464_s3 + $0x20] sm:$0xf] }
 0x289   : > { %430 = vmatpush1.bf16.msra.mxu1 %v424_v38  ;;  %842 = vmatprep.mubr.bf16.mxu0 %v1226_v16  ;;  %v549_v61 = vpop.permute.xlu0 %548 }
 0x28a   : > { %v797_v42 = vpack.c.bf16 %v795_v36, %v795_v36  ;;  %v798_v43 = vpack.c.bf16 %v796_v37, %v796_v37  ;;  %v473_v44 = vpop.permute.xlu1 %472 }
 0x28b   : > { %v475_v45 = vsel %vm474_vm7, %v471_v21, %v473_v44  ;;  %v476_v46 = vsel %vm474_vm7, %v473_v44, %v471_v21  ;;  %v1132_v21 = vld [vmem:[%s1464_s3 + $0x8] sm:$0xf] }
 0x28c   : > { %v490_v48 = vmul.f32 %v483_v35, %v476_v46  ;;  %v491_v50 = vmul.f32 %v487_v39, %v475_v45  ;;  %1149 = vmatprep.subr.msk.bf16.mxu0 %vm372_vm1, %v798_v43  ;;  %v805_v51 = vsel %vm372_vm1, %v797_v42, 0 }
 0x28d   : > { %811 = vmatpush1.bf16.msra.mxu0 %v805_v51  ;;  %v932_v14 = vpop.permute.xlu0 %931 }
 0x28e   : > { %v492_v55 = vpack.c.bf16 %v490_v48, %v490_v48  ;;  %v493_v56 = vpack.c.bf16 %v491_v50, %v491_v50  ;;  %v856_v57 = vpop.permute.xlu1 %855 }
 0x28f   : > { %v858_v58 = vsel %vm857_vm8, %v854_v41, %v856_v57  ;;  %v859_v59 = vsel %vm857_vm8, %v856_v57, %v854_v41 }
 0x290   : > { %v873_v62 = vmul.f32 %v866_v47, %v858_v58  ;;  %v874_v63 = vmul.f32 %v870_v52, %v859_v59  ;;  %1130 = vmatmul.mubr.msk.bf16.vlgmr.msra.gmra.mrb[0].mxu1 %vm368_vm2, %v341_v54  ;;  %1133 = vmatprep.subr.msk.bf16.mxu1 %vm372_vm1, %v493_v56  ;;  %v500_v0 = vsel %vm372_vm1, %v492_v55, 0 }
 0x291   : > { %506 = vmatpush1.bf16.msra.mxu1 %v500_v0  ;;  %537 = vmatprep.mubr.bf16.mxu1 %v1226_v16 }
 0x292   : > { %v875_v4 = vpack.c.bf16 %v873_v62, %v873_v62  ;;  %v876_v5 = vpack.c.bf16 %v874_v63, %v874_v63  ;;  %v551_v6 = vpop.permute.xlu1 %550 }
 0x293   : > { %v553_v7 = vsel %vm552_vm9, %v549_v61, %v551_v6  ;;  %v554_v8 = vsel %vm552_vm9, %v551_v6, %v549_v61 }
 0x294   : > { %v568_v10 = vmul.f32 %v561_v60, %v554_v8  ;;  %v569_v11 = vmul.f32 %v565_v1, %v553_v7  ;;  %1150 = vmatmul.mubr.msk.bf16.vlgmr.msra.gmra.mrb[0].mxu0 %vm368_vm2, %v1148_v3  ;;  %1153 = vmatprep.subr.msk.bf16.mxu0 %vm372_vm1, %v876_v5  ;;  %v883_v12 = vsel %vm372_vm1, %v875_v4, 0 }
 0x295   : > { %889 = vmatpush1.bf16.msra.mxu0 %v883_v12  ;;  %920 = vmatprep.mubr.bf16.mxu0 %v1226_v16 }
 0x296   : > { %v571_v15 = vpack.c.bf16 %v569_v11, %v569_v11  ;;  %v934_v17 = vpop.permute.xlu1 %933  ;;  %v570_v19 = vpack.c.bf16 %v568_v10, %v568_v10 }
 0x297   : > { %v936_v18 = vsel %vm935_vm10, %v932_v14, %v934_v17  ;;  %v937_v49 = vsel %vm935_vm10, %v934_v17, %v932_v14 }
 0x298   : > { %v951_v32 = vmul.f32 %v944_v9, %v936_v18  ;;  %v952_v20 = vmul.f32 %v948_v13, %v937_v49  ;;  %1137 = vmatprep.subr.msk.bf16.mxu1 %vm372_vm1, %v571_v15  ;;  %v578_v31 = vsel %vm372_vm1, %v570_v19, 0 }
 0x29a   : > { %v954_v22 = vpack.c.bf16 %v952_v20, %v952_v20  ;;  %v953_v23 = vpack.c.bf16 %v951_v32, %v951_v32 }
 0x29c   : > { %1134 = vmatmul.mubr.msk.bf16.vlgmr.msra.gmra.mrb[0].mxu1 %vm368_vm2, %v1132_v21  ;;  %1157 = vmatprep.subr.msk.bf16.mxu0 %vm372_vm1, %v954_v22  ;;  %v961_v25 = vsel %vm372_vm1, %v953_v23, 0 }
 0x29d   : > { %584 = vmatpush1.bf16.msra.mxu1 %v578_v31  ;;  %615 = vmatprep.mubr.bf16.mxu1 %v1226_v16 }
 0x2a0   : > { %1154 = vmatmul.mubr.msk.bf16.vlgmr.msra.gmra.mrb[0].mxu0 %vm368_vm2, %v1152_v24 }
 0x2a1   : > { %967 = vmatpush1.bf16.msra.mxu0 %v961_v25  ;;  %998 = vmatprep.mubr.bf16.mxu0 %v1226_v16 }
 0x2a8   : > { %1138 = vmatmul.mubr.msk.bf16.vlgmr.msra.gmra.mrb[0].mxu1 %vm368_vm2, %v1136_v26 }
 0x2ac   : > { %1158 = vmatmul.mubr.msk.bf16.vlgmr.msra.gmra.mrb[0].mxu0 %vm368_vm2, %v1156_v27 }
 0x37b   : > { %v617_v28 = vpop.f32.mrb[0].mxu1 }
 0x37c   : > { %v619_v29 = vpop.f32.mrb[1].mxu1 }
 0x37d   : > { %v621_v30 = vpop.f32.mrb[2].mxu1 }
 0x37e   : > { %v622_v33 = vpop.f32.mrb[3].mxu1 }
 0x37f   : > { %v1000_v34 = vpop.f32.mrb[0].mxu0 }
 0x380   : > { %v1165_v35 = vadd.f32 %v1000_v34, %v617_v28  ;;  %v1002_v16 = vpop.f32.mrb[1].mxu0 }
 0x381   : > { %v1166_v36 = vadd.f32 %v1002_v16, %v619_v29  ;;  %v1004_v37 = vpop.f32.mrb[2].mxu0 }
 0x382   : > { %v1005_v38 = vpop.f32.mrb[3].mxu0  ;;  %v1021_v39 = vmul.f32 %v1165_v35, %v1165_v35 }
 0x383   : > { %v1164_v40 = vpack.c.bf16 %v1166_v36, %v1165_v35  ;;  %v1018_v41 = vadd.f32 %v1166_v36, %v1165_v35  ;;  %v1022_v42 = vmul.f32 %v1166_v36, %v1166_v36 }
 0x385   : > { %1017 = vst [vmem:[%s258_s15] sm:$0xff] %v1164_v40  ;;  %1019 = vadd.xlane.f32.xlu0 %v1018_v41  ;;  %v1023_v43 = vadd.f32 %v1022_v42, %v1021_v39 }
 0x387   : > { %1024 = vadd.xlane.f32.xlu1 %v1023_v43 }
 0x412   : > { %v1020_v44 = vpop.xlane.xlu0 %1019 }
 0x414   : > { %v1025_v45 = vpop.xlane.xlu1 %1024 }
 0x415   : > { %v1027_v46 = vsel %vm1026_vm11, %v1020_v44, %v1025_v45 }
 0x416   : > { %1028 = vst.msk [vmem:[%s262_s18] sm:$0xff] %vm268_vm0, %v1027_v46 }
 0x417 PF: > { %s17_s21 = sadd.s32 1, %s1223_s21  }
 0x418   : > { %p14_p4 = scmp.ge.s32.totalorder %s17_s21, 4  }
 0x41a   :  { %16 = sbr.rel (!%p14_p4) target bundleno = 1 (0x1), region = 98 }

</bundles_post_ra>
